<compile_context>
chip_gen: v6e
topology: v6e:2x2x1
jax: 0.10.0
libtpu: 0.0.40
codegen_flags: <defaults>
</compile_context>

<pallas_src>
import functools

import jax
import jax.numpy as jnp
from jax.experimental import pallas as pl
from jax.experimental.pallas import tpu as pltpu

_BN_EPS = 1e-5


# --------------------------------------------------------------------------
# Small helpers
# --------------------------------------------------------------------------
def _round_up(x, m):
    return ((x + m - 1) // m) * m


def _vmem_cap_bytes():
    """~75% of physical VMEM (96 MiB v5e/v6e, 48 MiB v7x); v7x-safe fallback."""
    try:
        cap = int(pltpu.get_tpu_info().vmem_capacity_bytes)
    except Exception:
        cap = 64 * 1024 * 1024
    return int(cap * 3 // 4)


def _sum_and_sumsq(x):
    """Per-lane sum and sum-of-squares of an (R, C) f32 slab.

    Chunked so each row block is read from VMEM once for both accumulations
    (one vld pass instead of two when the ld/st slots are the limiter)."""
    rows, cols = x.shape
    nchunks = 8
    if rows % nchunks == 0 and (rows // nchunks) % 8 == 0:
        chunk = rows // nchunks
        s = jnp.zeros((1, cols), jnp.float32)
        q = jnp.zeros((1, cols), jnp.float32)
        for i in range(nchunks):
            blk = x[i * chunk:(i + 1) * chunk]
            s = s + jnp.sum(blk, axis=0, keepdims=True)
            q = q + jnp.sum(blk * blk, axis=0, keepdims=True)
        return s, q
    return (jnp.sum(x, axis=0, keepdims=True),
            jnp.sum(x * x, axis=0, keepdims=True))


def _fold_groups(v, d, p):
    """Sum a (1, p*d) row across its p lane-groups of width d.

    Shifts are multiples of d, so channel alignment is preserved; log2(p)
    roll+add passes on the XLU slot (essentially free)."""
    shift = (p * d) // 2
    while shift >= d:
        v = v + pltpu.roll(v, shift=shift, axis=1)
        shift //= 2
    return v


def _bn_scale_shift(x, gamma, beta, inv_m, d, p):
    """Training-mode BatchNorm folded into a per-channel (scale, shift)."""
    s, q = _sum_and_sumsq(x)
    s = _fold_groups(s, d, p)
    q = _fold_groups(q, d, p)
    mean = s * inv_m
    var = q * inv_m - mean * mean          # biased variance (training mode)
    scale = gamma * jax.lax.rsqrt(var + _BN_EPS)
    shift = beta - mean * scale
    return scale, shift


def _sigmoid(x):
    # exp + approximate reciprocal both land on the (otherwise idle) EUP slot.
    return pl.reciprocal(1.0 + jnp.exp(-x), approx=True)


# --------------------------------------------------------------------------
# Monolithic single-block kernel (whole problem resident in VMEM)
# --------------------------------------------------------------------------
def _monolithic_kernel(hs_ref, ht_ref, wxs_ref, wxt_ref, w1_ref, w2_ref,
                       gamma_ref, beta_ref, out_ref, *, d, p, inv_m, n_pad):
    hs_in = hs_ref[...]
    ht_in = ht_ref[...]
    hs = hs_in.astype(jnp.float32)
    ht = ht_in.astype(jnp.float32)

    # Gate pre-activations: two 128-wide block-diagonal matmuls (no concat).
    xs_pre = jnp.dot(hs_in.astype(jnp.bfloat16), wxs_ref[...],
                     preferred_element_type=jnp.float32)
    xt_pre = jnp.dot(ht_in.astype(jnp.bfloat16), wxt_ref[...],
                     preferred_element_type=jnp.float32)

    s_xs, t_xs = _bn_scale_shift(xs_pre, gamma_ref[0:1, :], beta_ref[0:1, :],
                                 inv_m, d, p)
    s_xt, t_xt = _bn_scale_shift(xt_pre, gamma_ref[1:2, :], beta_ref[1:2, :],
                                 inv_m, d, p)
    z = _sigmoid(xs_pre * s_xs + xt_pre * s_xt + (t_xs + t_xt))
    h = ht + z * (hs - ht)                 # zero on zero-padded rows

    # FC_h layer 1: matmul + BN + relu.
    h1_pre = jnp.dot(h.astype(jnp.bfloat16), w1_ref[...],
                     preferred_element_type=jnp.float32)
    s1, t1 = _bn_scale_shift(h1_pre, gamma_ref[2:3, :], beta_ref[2:3, :],
                             inv_m, d, p)
    h1 = jnp.maximum(h1_pre * s1 + t1, 0.0)

    # FC_h layer 2: matmul + BN. Padded rows contribute h1 = relu(t1) != 0,
    # so their (known, identical) h2_pre contribution is removed analytically
    # from the statistics instead of masking.
    h2_pre = jnp.dot(h1.astype(jnp.bfloat16), w2_ref[...],
                     preferred_element_type=jnp.float32)
    s_sum, s_sq = _sum_and_sumsq(h2_pre)
    s_sum = _fold_groups(s_sum, d, p)
    s_sq = _fold_groups(s_sq, d, p)
    if n_pad:
        v = jnp.dot(jnp.maximum(t1, 0.0).astype(jnp.bfloat16), w2_ref[...],
                    preferred_element_type=jnp.float32)
        s_sum = s_sum - float(n_pad) * v
        s_sq = s_sq - float(n_pad) * (v * v)
    mean2 = s_sum * inv_m
    var2 = s_sq * inv_m - mean2 * mean2
    sc2 = gamma_ref[3:4, :] * jax.lax.rsqrt(var2 + _BN_EPS)
    sh2 = beta_ref[3:4, :] - mean2 * sc2
    out_ref[...] = (h2_pre * sc2 + sh2).astype(out_ref.dtype)


# --------------------------------------------------------------------------
# Tiled multi-pass kernels (grid over M tiles, both TensorCores on v7x)
# --------------------------------------------------------------------------
def _stats_gate_kernel(hs_ref, ht_ref, wxs_ref, wxt_ref, stats_ref):
    xs = jnp.dot(hs_ref[...].astype(jnp.bfloat16), wxs_ref[...],
                 preferred_element_type=jnp.float32)
    xt = jnp.dot(ht_ref[...].astype(jnp.bfloat16), wxt_ref[...],
                 preferred_element_type=jnp.float32)
    s_xs, q_xs = _sum_and_sumsq(xs)
    s_xt, q_xt = _sum_and_sumsq(xt)
    stats_ref[...] = jnp.concatenate([s_xs, q_xs, s_xt, q_xt], axis=0)[None]


def _gate_h1_kernel(hs_ref, ht_ref, wxs_ref, wxt_ref, w1_ref, aff_ref,
                    h1pre_ref, stats_ref):
    hs_in = hs_ref[...]
    ht_in = ht_ref[...]
    hs = hs_in.astype(jnp.float32)
    ht = ht_in.astype(jnp.float32)
    xs = jnp.dot(hs_in.astype(jnp.bfloat16), wxs_ref[...],
                 preferred_element_type=jnp.float32)
    xt = jnp.dot(ht_in.astype(jnp.bfloat16), wxt_ref[...],
                 preferred_element_type=jnp.float32)
    z = _sigmoid(xs * aff_ref[0:1, :] + xt * aff_ref[1:2, :] + aff_ref[2:3, :])
    h = ht + z * (hs - ht)
    h1_pre = jnp.dot(h.astype(jnp.bfloat16), w1_ref[...],
                     preferred_element_type=jnp.float32)
    h1pre_ref[...] = h1_pre
    s, q = _sum_and_sumsq(h1_pre)
    stats_ref[...] = jnp.concatenate([s, q], axis=0)[None]


def _h1_stats_kernel(h1pre_ref, w2_ref, aff1_ref, stats_ref):
    h1 = jnp.maximum(h1pre_ref[...] * aff1_ref[0:1, :] + aff1_ref[1:2, :], 0.0)
    h2_pre = jnp.dot(h1.astype(jnp.bfloat16), w2_ref[...],
                     preferred_element_type=jnp.float32)
    s, q = _sum_and_sumsq(h2_pre)
    stats_ref[...] = jnp.concatenate([s, q], axis=0)[None]


def _finalize_kernel(h1pre_ref, w2_ref, aff1_ref, aff2_ref, out_ref):
    h1 = jnp.maximum(h1pre_ref[...] * aff1_ref[0:1, :] + aff1_ref[1:2, :], 0.0)
    h2_pre = jnp.dot(h1.astype(jnp.bfloat16), w2_ref[...],
                     preferred_element_type=jnp.float32)
    out_ref[...] = (h2_pre * aff2_ref[0:1, :] + aff2_ref[1:2, :]).astype(
        out_ref.dtype)


# --------------------------------------------------------------------------
# Host wrapper
# --------------------------------------------------------------------------
def _prep_params(Wxs, Wxt, Wh1, Wh2, gammas, betas, p):
    """Block-diagonal lane-packed weights (bf16) and tiled BN params (f32)."""
    eye = jnp.eye(p, dtype=jnp.float32)
    wxs_bd = jnp.kron(eye, Wxs.astype(jnp.float32)).astype(jnp.bfloat16)
    wxt_bd = jnp.kron(eye, Wxt.astype(jnp.float32)).astype(jnp.bfloat16)
    w1_bd = jnp.kron(eye, Wh1.astype(jnp.float32)).astype(jnp.bfloat16)
    w2_bd = jnp.kron(eye, Wh2.astype(jnp.float32)).astype(jnp.bfloat16)
    gammas_p = jnp.tile(gammas.astype(jnp.float32), (1, p))
    betas_p = jnp.tile(betas.astype(jnp.float32), (1, p))
    return wxs_bd, wxt_bd, w1_bd, w2_bd, gammas_p, betas_p


def _finish_bn(s, q, gamma, beta, inv_m):
    mean = s * inv_m
    var = q * inv_m - mean * mean
    scale = gamma * jax.lax.rsqrt(var + _BN_EPS)
    shift = beta - mean * scale
    return scale, shift


def gated_fusion(HS, HT, Wxs, Wxt, Wh1, Wh2, gammas, betas, *,
                 block_rows=512, force_tiled=False):
    """GMAN GatedFusion forward.

    HS, HT: (B, T, N, D) f32 or bf16. Wxs/Wxt/Wh1/Wh2: (D, D), in->out
    (transposed 1x1-conv weights). gammas/betas: (4, D) BN affine params for
    the [xs, xt, h1, h2] BatchNorms. Conv biases are omitted: a per-channel
    constant added before training-mode BN cancels exactly.
    """
    B, T, N, D = HS.shape
    M = B * T * N

    # Lane packing: P consecutive rows fill the 128-lane axis.
    P = 128 // D if (D <= 128 and 128 % D == 0) else 1
    PD = P * D
    in_dtype = jnp.bfloat16 if HS.dtype == jnp.bfloat16 else jnp.float32
    gammas = gammas.astype(jnp.float32)
    betas = betas.astype(jnp.float32)

    vmem_cap = _vmem_cap_bytes()
    mp_min = -(-M // P)
    mp_mono = _round_up(max(mp_min, 8), 8)
    mono_bytes = 14 * mp_mono * PD * 4 + 4 * PD * PD * 2
    use_tiled = force_tiled or mono_bytes > int(0.6 * vmem_cap)

    if use_tiled:
        tm = max(8, _round_up(min(block_rows, mp_min), 8))
        Mp = _round_up(mp_min, tm)
    else:
        Mp = mp_mono
    n_pad = Mp * P - M     # zero-padded original rows (excluded from BN stats)

    def pack(x):
        x2 = x.reshape(M, D).astype(in_dtype)
        if n_pad:
            x2 = jnp.concatenate(
                [x2, jnp.zeros((n_pad, D), in_dtype)], axis=0)
        return x2.reshape(Mp, PD)

    hs2 = pack(HS)
    ht2 = pack(HT)
    wxs_bd, wxt_bd, w1_bd, w2_bd, gammas_p, betas_p = _prep_params(
        Wxs, Wxt, Wh1, Wh2, gammas, betas, P)
    inv_m = 1.0 / M

    if not use_tiled:
        kern = functools.partial(_monolithic_kernel, d=D, p=P, inv_m=inv_m,
                                 n_pad=n_pad)
        out = pl.pallas_call(
            kern,
            out_shape=jax.ShapeDtypeStruct((Mp, PD), jnp.float32),
            in_specs=[pl.BlockSpec(memory_space=pltpu.MemorySpace.VMEM)] * 8,
            out_specs=pl.BlockSpec(memory_space=pltpu.MemorySpace.VMEM),
            compiler_params=pltpu.CompilerParams(vmem_limit_bytes=vmem_cap),
        )(hs2, ht2, wxs_bd, wxt_bd, w1_bd, w2_bd, gammas_p, betas_p)
        return out.reshape(Mp * P, D)[:M].reshape(B, T, N, D)

    # ---------------- tiled multi-pass path ----------------
    ntiles = Mp // tm
    cp = pltpu.CompilerParams(dimension_semantics=("parallel",),
                              vmem_limit_bytes=vmem_cap)
    row_spec = pl.BlockSpec((tm, PD), lambda i: (i, 0))
    w_spec = pl.BlockSpec((PD, PD), lambda i: (0, 0))

    def aff_spec(k):
        return pl.BlockSpec((k, PD), lambda i: (0, 0))

    def stats_spec(k):
        return pl.BlockSpec((1, k, PD), lambda i: (i, 0, 0))

    # NOTE: global BN stats use plain f32 sum / sum-of-squares per tile; for
    # very large M a centered (Welford-style) combine would be more robust.

    # Pass A: gate pre-activation statistics (xs_pre / xt_pre recomputed later).
    stats_g = pl.pallas_call(
        _stats_gate_kernel,
        grid=(ntiles,),
        out_shape=jax.ShapeDtypeStruct((ntiles, 4, PD), jnp.float32),
        in_specs=[row_spec, row_spec, w_spec, w_spec],
        out_specs=stats_spec(4),
        compiler_params=cp,
    )(hs2, ht2, wxs_bd, wxt_bd)
    sg = stats_g.reshape(ntiles, 4, P, D).sum(axis=(0, 2))
    s_xs, t_xs = _finish_bn(sg[0], sg[1], gammas[0], betas[0], inv_m)
    s_xt, t_xt = _finish_bn(sg[2], sg[3], gammas[1], betas[1], inv_m)
    gate_aff = jnp.tile(jnp.stack([s_xs, s_xt, t_xs + t_xt]), (1, P))

    # Pass B: gate + FC_h layer-1 matmul; spill h1_pre once, emit h1 stats.
    h1_pre, stats_1 = pl.pallas_call(
        _gate_h1_kernel,
        grid=(ntiles,),
        out_shape=(jax.ShapeDtypeStruct((Mp, PD), jnp.float32),
                   jax.ShapeDtypeStruct((ntiles, 2, PD), jnp.float32)),
        in_specs=[row_spec, row_spec, w_spec, w_spec, w_spec, aff_spec(3)],
        out_specs=(row_spec, stats_spec(2)),
        compiler_params=cp,
    )(hs2, ht2, wxs_bd, wxt_bd, w1_bd, gate_aff)
    s1s = stats_1.reshape(ntiles, 2, P, D).sum(axis=(0, 2))
    s1, t1 = _finish_bn(s1s[0], s1s[1], gammas[2], betas[2], inv_m)
    aff1 = jnp.tile(jnp.stack([s1, t1]), (1, P))

    # Pass C: FC_h layer-2 statistics (h2_pre recomputed, not spilled).
    stats_2 = pl.pallas_call(
        _h1_stats_kernel,
        grid=(ntiles,),
        out_shape=jax.ShapeDtypeStruct((ntiles, 2, PD), jnp.float32),
        in_specs=[row_spec, w_spec, aff_spec(2)],
        out_specs=stats_spec(2),
        compiler_params=cp,
    )(h1_pre, w2_bd, aff1)
    s2s = stats_2.reshape(ntiles, 2, P, D).sum(axis=(0, 2))
    if n_pad:
        # Padded rows carry h1 = relu(t1) (their h1_pre is exactly zero), so
        # remove their known, identical h2_pre contribution analytically.
        v = jnp.dot(jnp.maximum(t1, 0.0).astype(jnp.bfloat16)[None],
                    Wh2.astype(jnp.bfloat16),
                    preferred_element_type=jnp.float32)[0]
        s2s = jnp.stack([s2s[0] - n_pad * v, s2s[1] - n_pad * v * v])
    s2, t2 = _finish_bn(s2s[0], s2s[1], gammas[3], betas[3], inv_m)
    aff2 = jnp.tile(jnp.stack([s2, t2]), (1, P))

    # Pass D: recompute h1 / h2_pre, apply the final BN affine, write output.
    out = pl.pallas_call(
        _finalize_kernel,
        grid=(ntiles,),
        out_shape=jax.ShapeDtypeStruct((Mp, PD), jnp.float32),
        in_specs=[row_spec, w_spec, aff_spec(2), aff_spec(2)],
        out_specs=row_spec,
        compiler_params=cp,
    )(h1_pre, w2_bd, aff1, aff2)
    return out.reshape(Mp * P, D)[:M].reshape(B, T, N, D)


# --------------------------------------------------------------------------
# Pure-JAX reference (training-mode BN) and test harness
# --------------------------------------------------------------------------
def _reference(HS, HT, Wxs, Wxt, Wh1, Wh2, gammas, betas):
    B, T, N, D = HS.shape
    hs = HS.reshape(-1, D).astype(jnp.float32)
    ht = HT.reshape(-1, D).astype(jnp.float32)

    def bn(x, g, b):
        mu = jnp.mean(x, axis=0, keepdims=True)
        var = jnp.mean((x - mu) ** 2, axis=0, keepdims=True)
        return g * (x - mu) * jax.lax.rsqrt(var + _BN_EPS) + b

    xs = bn(hs @ Wxs, gammas[0], betas[0])
    xt = bn(ht @ Wxt, gammas[1], betas[1])
    z = jax.nn.sigmoid(xs + xt)
    h = z * hs + (1.0 - z) * ht
    h1 = jnp.maximum(bn(h @ Wh1, gammas[2], betas[2]), 0.0)
    h2 = bn(h1 @ Wh2, gammas[3], betas[3])
    return h2.reshape(B, T, N, D)


def _xavier_uniform(key, fan_out, fan_in):
    bound = (6.0 / (fan_in + fan_out)) ** 0.5
    return jax.random.uniform(key, (fan_out, fan_in), jnp.float32, -bound, bound)


if __name__ == "__main__":
    B, T, N, D = 2, 8, 16, 32  # batch, num_step, num_nodes, D

    key = jax.random.PRNGKey(0)
    (k_hs, k_ht, k_wxs, k_wxt, k_wh1, k_wh2, k_g, k_b) = jax.random.split(key, 8)

    HS = jax.random.normal(k_hs, (B, T, N, D), jnp.float32)
    HT = jax.random.normal(k_ht, (B, T, N, D), jnp.float32)

    # Conv2d 1x1 weights, torch layout (out, in); transpose to (in, out) for x @ W.
    Wxs = _xavier_uniform(k_wxs, D, D).T
    Wxt = _xavier_uniform(k_wxt, D, D).T
    Wh1 = _xavier_uniform(k_wh1, D, D).T
    Wh2 = _xavier_uniform(k_wh2, D, D).T

    gammas = 1.0 + 0.1 * jax.random.normal(k_g, (4, D), jnp.float32)
    betas = 0.1 * jax.random.normal(k_b, (4, D), jnp.float32)

    # 1) Monolithic single-block path (slab fits comfortably in VMEM).
    out = gated_fusion(HS, HT, Wxs, Wxt, Wh1, Wh2, gammas, betas)
    jax.block_until_ready(out)
    assert out.shape == (B, T, N, D)
    ref = _reference(HS, HT, Wxs, Wxt, Wh1, Wh2, gammas, betas)
    err = float(jnp.max(jnp.abs(out - ref)))
    assert err < 1.5e-1, f"monolithic max abs error vs reference: {err}"

    # 2) Shape requiring zero-row padding (M not a multiple of P*8):
    #    exercise both the monolithic path and the tiled multi-pass path.
    N2 = 15
    HS2 = jax.random.normal(k_hs, (B, T, N2, D), jnp.float32)
    HT2 = jax.random.normal(k_ht, (B, T, N2, D), jnp.float32)
    ref2 = _reference(HS2, HT2, Wxs, Wxt, Wh1, Wh2, gammas, betas)

    out_mono = gated_fusion(HS2, HT2, Wxs, Wxt, Wh1, Wh2, gammas, betas)
    jax.block_until_ready(out_mono)
    err_mono = float(jnp.max(jnp.abs(out_mono - ref2)))
    assert err_mono < 1.5e-1, f"padded monolithic max abs error: {err_mono}"

    out_tiled = gated_fusion(HS2, HT2, Wxs, Wxt, Wh1, Wh2, gammas, betas,
                             block_rows=16, force_tiled=True)
    jax.block_until_ready(out_tiled)
    err_tiled = float(jnp.max(jnp.abs(out_tiled - ref2)))
    assert err_tiled < 1.5e-1, f"tiled max abs error: {err_tiled}"

    print("KERNEL_OK")
</pallas_src>

<mosaic_0001>
module attributes {stable_mosaic.version = 11 : i64} {
  func.func @_monolithic_kernel(%arg0: memref<64x128xf32, #tpu.memory_space<vmem>>, %arg1: memref<64x128xf32, #tpu.memory_space<vmem>>, %arg2: memref<128x128xbf16, #tpu.memory_space<vmem>>, %arg3: memref<128x128xbf16, #tpu.memory_space<vmem>>, %arg4: memref<128x128xbf16, #tpu.memory_space<vmem>>, %arg5: memref<128x128xbf16, #tpu.memory_space<vmem>>, %arg6: memref<4x128xf32, #tpu.memory_space<vmem>>, %arg7: memref<4x128xf32, #tpu.memory_space<vmem>>, %arg8: memref<64x128xf32, #tpu.memory_space<vmem>>) attributes {dimension_semantics = [], scalar_prefetch = 0 : i64, scratch_operands = 0 : i64, tpu.core_type = #tpu.core_type<tc>} {
    %c0 = arith.constant 0 : index
    %c0_0 = arith.constant 0 : index
    %0 = vector.load %arg0[%c0, %c0_0] : memref<64x128xf32, #tpu.memory_space<vmem>>, vector<64x128xf32>
    %c0_1 = arith.constant 0 : index
    %c0_2 = arith.constant 0 : index
    %1 = vector.load %arg1[%c0_1, %c0_2] : memref<64x128xf32, #tpu.memory_space<vmem>>, vector<64x128xf32>
    %2 = arith.truncf %0 : vector<64x128xf32> to vector<64x128xbf16>
    %c0_3 = arith.constant 0 : index
    %c0_4 = arith.constant 0 : index
    %3 = vector.load %arg2[%c0_3, %c0_4] : memref<128x128xbf16, #tpu.memory_space<vmem>>, vector<128x128xbf16>
    %cst = arith.constant dense<0.000000e+00> : vector<64x128xf32>
    %4 = tpu.matmul %2, %3, %cst {dimension_numbers = #tpu.dot_dimension_numbers<[1], [0], [0], [1], [0, 0, 1, 1], [], []>} : vector<64x128xbf16>, vector<128x128xbf16>, vector<64x128xf32> -> vector<64x128xf32>
    %5 = arith.truncf %1 : vector<64x128xf32> to vector<64x128xbf16>
    %c0_5 = arith.constant 0 : index
    %c0_6 = arith.constant 0 : index
    %6 = vector.load %arg3[%c0_5, %c0_6] : memref<128x128xbf16, #tpu.memory_space<vmem>>, vector<128x128xbf16>
    %cst_7 = arith.constant dense<0.000000e+00> : vector<64x128xf32>
    %7 = tpu.matmul %5, %6, %cst_7 {dimension_numbers = #tpu.dot_dimension_numbers<[1], [0], [0], [1], [0, 0, 1, 1], [], []>} : vector<64x128xbf16>, vector<128x128xbf16>, vector<64x128xf32> -> vector<64x128xf32>
    %c0_8 = arith.constant 0 : index
    %c0_9 = arith.constant 0 : index
    %8 = vector.load %arg6[%c0_8, %c0_9] : memref<4x128xf32, #tpu.memory_space<vmem>>, vector<1x128xf32>
    %c0_10 = arith.constant 0 : index
    %c0_11 = arith.constant 0 : index
    %9 = vector.load %arg7[%c0_10, %c0_11] : memref<4x128xf32, #tpu.memory_space<vmem>>, vector<1x128xf32>
    %cst_12 = arith.constant 0.000000e+00 : f32
    %10 = vector.broadcast %cst_12 : f32 to vector<1x128xf32>
    %cst_13 = arith.constant 0.000000e+00 : f32
    %11 = vector.broadcast %cst_13 : f32 to vector<1x128xf32>
    %12 = vector.extract_strided_slice %4 {offsets = [0, 0], sizes = [8, 128], strides = [1, 1]} : vector<64x128xf32> to vector<8x128xf32>
    %cst_14 = arith.constant dense<0.000000e+00> : vector<128xf32>
    %13 = vector.multi_reduction <add>, %12, %cst_14 [0] : vector<8x128xf32> to vector<128xf32>
    %14 = vector.shape_cast %13 : vector<128xf32> to vector<1x128xf32>
    %15 = arith.addf %10, %14 : vector<1x128xf32>
    %16 = arith.mulf %12, %12 : vector<8x128xf32>
    %cst_15 = arith.constant dense<0.000000e+00> : vector<128xf32>
    %17 = vector.multi_reduction <add>, %16, %cst_15 [0] : vector<8x128xf32> to vector<128xf32>
    %18 = vector.shape_cast %17 : vector<128xf32> to vector<1x128xf32>
    %19 = arith.addf %11, %18 : vector<1x128xf32>
    %20 = vector.extract_strided_slice %4 {offsets = [8, 0], sizes = [8, 128], strides = [1, 1]} : vector<64x128xf32> to vector<8x128xf32>
    %cst_16 = arith.constant dense<0.000000e+00> : vector<128xf32>
    %21 = vector.multi_reduction <add>, %20, %cst_16 [0] : vector<8x128xf32> to vector<128xf32>
    %22 = vector.shape_cast %21 : vector<128xf32> to vector<1x128xf32>
    %23 = arith.addf %15, %22 : vector<1x128xf32>
    %24 = arith.mulf %20, %20 : vector<8x128xf32>
    %cst_17 = arith.constant dense<0.000000e+00> : vector<128xf32>
    %25 = vector.multi_reduction <add>, %24, %cst_17 [0] : vector<8x128xf32> to vector<128xf32>
    %26 = vector.shape_cast %25 : vector<128xf32> to vector<1x128xf32>
    %27 = arith.addf %19, %26 : vector<1x128xf32>
    %28 = vector.extract_strided_slice %4 {offsets = [16, 0], sizes = [8, 128], strides = [1, 1]} : vector<64x128xf32> to vector<8x128xf32>
    %cst_18 = arith.constant dense<0.000000e+00> : vector<128xf32>
    %29 = vector.multi_reduction <add>, %28, %cst_18 [0] : vector<8x128xf32> to vector<128xf32>
    %30 = vector.shape_cast %29 : vector<128xf32> to vector<1x128xf32>
    %31 = arith.addf %23, %30 : vector<1x128xf32>
    %32 = arith.mulf %28, %28 : vector<8x128xf32>
    %cst_19 = arith.constant dense<0.000000e+00> : vector<128xf32>
    %33 = vector.multi_reduction <add>, %32, %cst_19 [0] : vector<8x128xf32> to vector<128xf32>
    %34 = vector.shape_cast %33 : vector<128xf32> to vector<1x128xf32>
    %35 = arith.addf %27, %34 : vector<1x128xf32>
    %36 = vector.extract_strided_slice %4 {offsets = [24, 0], sizes = [8, 128], strides = [1, 1]} : vector<64x128xf32> to vector<8x128xf32>
    %cst_20 = arith.constant dense<0.000000e+00> : vector<128xf32>
    %37 = vector.multi_reduction <add>, %36, %cst_20 [0] : vector<8x128xf32> to vector<128xf32>
    %38 = vector.shape_cast %37 : vector<128xf32> to vector<1x128xf32>
    %39 = arith.addf %31, %38 : vector<1x128xf32>
    %40 = arith.mulf %36, %36 : vector<8x128xf32>
    %cst_21 = arith.constant dense<0.000000e+00> : vector<128xf32>
    %41 = vector.multi_reduction <add>, %40, %cst_21 [0] : vector<8x128xf32> to vector<128xf32>
    %42 = vector.shape_cast %41 : vector<128xf32> to vector<1x128xf32>
    %43 = arith.addf %35, %42 : vector<1x128xf32>
    %44 = vector.extract_strided_slice %4 {offsets = [32, 0], sizes = [8, 128], strides = [1, 1]} : vector<64x128xf32> to vector<8x128xf32>
    %cst_22 = arith.constant dense<0.000000e+00> : vector<128xf32>
    %45 = vector.multi_reduction <add>, %44, %cst_22 [0] : vector<8x128xf32> to vector<128xf32>
    %46 = vector.shape_cast %45 : vector<128xf32> to vector<1x128xf32>
    %47 = arith.addf %39, %46 : vector<1x128xf32>
    %48 = arith.mulf %44, %44 : vector<8x128xf32>
    %cst_23 = arith.constant dense<0.000000e+00> : vector<128xf32>
    %49 = vector.multi_reduction <add>, %48, %cst_23 [0] : vector<8x128xf32> to vector<128xf32>
    %50 = vector.shape_cast %49 : vector<128xf32> to vector<1x128xf32>
    %51 = arith.addf %43, %50 : vector<1x128xf32>
    %52 = vector.extract_strided_slice %4 {offsets = [40, 0], sizes = [8, 128], strides = [1, 1]} : vector<64x128xf32> to vector<8x128xf32>
    %cst_24 = arith.constant dense<0.000000e+00> : vector<128xf32>
    %53 = vector.multi_reduction <add>, %52, %cst_24 [0] : vector<8x128xf32> to vector<128xf32>
    %54 = vector.shape_cast %53 : vector<128xf32> to vector<1x128xf32>
    %55 = arith.addf %47, %54 : vector<1x128xf32>
    %56 = arith.mulf %52, %52 : vector<8x128xf32>
    %cst_25 = arith.constant dense<0.000000e+00> : vector<128xf32>
    %57 = vector.multi_reduction <add>, %56, %cst_25 [0] : vector<8x128xf32> to vector<128xf32>
    %58 = vector.shape_cast %57 : vector<128xf32> to vector<1x128xf32>
    %59 = arith.addf %51, %58 : vector<1x128xf32>
    %60 = vector.extract_strided_slice %4 {offsets = [48, 0], sizes = [8, 128], strides = [1, 1]} : vector<64x128xf32> to vector<8x128xf32>
    %cst_26 = arith.constant dense<0.000000e+00> : vector<128xf32>
    %61 = vector.multi_reduction <add>, %60, %cst_26 [0] : vector<8x128xf32> to vector<128xf32>
    %62 = vector.shape_cast %61 : vector<128xf32> to vector<1x128xf32>
    %63 = arith.addf %55, %62 : vector<1x128xf32>
    %64 = arith.mulf %60, %60 : vector<8x128xf32>
    %cst_27 = arith.constant dense<0.000000e+00> : vector<128xf32>
    %65 = vector.multi_reduction <add>, %64, %cst_27 [0] : vector<8x128xf32> to vector<128xf32>
    %66 = vector.shape_cast %65 : vector<128xf32> to vector<1x128xf32>
    %67 = arith.addf %59, %66 : vector<1x128xf32>
    %68 = vector.extract_strided_slice %4 {offsets = [56, 0], sizes = [8, 128], strides = [1, 1]} : vector<64x128xf32> to vector<8x128xf32>
    %cst_28 = arith.constant dense<0.000000e+00> : vector<128xf32>
    %69 = vector.multi_reduction <add>, %68, %cst_28 [0] : vector<8x128xf32> to vector<128xf32>
    %70 = vector.shape_cast %69 : vector<128xf32> to vector<1x128xf32>
    %71 = arith.addf %63, %70 : vector<1x128xf32>
    %72 = arith.mulf %68, %68 : vector<8x128xf32>
    %cst_29 = arith.constant dense<0.000000e+00> : vector<128xf32>
    %73 = vector.multi_reduction <add>, %72, %cst_29 [0] : vector<8x128xf32> to vector<128xf32>
    %74 = vector.shape_cast %73 : vector<128xf32> to vector<1x128xf32>
    %75 = arith.addf %67, %74 : vector<1x128xf32>
    %c64_i32 = arith.constant 64 : i32
    %76 = tpu.dynamic_rotate %71 by %c64_i32 dim 1 : vector<1x128xf32>, i32 -> vector<1x128xf32>
    %77 = arith.addf %71, %76 : vector<1x128xf32>
    %c32_i32 = arith.constant 32 : i32
    %78 = tpu.dynamic_rotate %77 by %c32_i32 dim 1 : vector<1x128xf32>, i32 -> vector<1x128xf32>
    %79 = arith.addf %77, %78 : vector<1x128xf32>
    %c64_i32_30 = arith.constant 64 : i32
    %80 = tpu.dynamic_rotate %75 by %c64_i32_30 dim 1 : vector<1x128xf32>, i32 -> vector<1x128xf32>
    %81 = arith.addf %75, %80 : vector<1x128xf32>
    %c32_i32_31 = arith.constant 32 : i32
    %82 = tpu.dynamic_rotate %81 by %c32_i32_31 dim 1 : vector<1x128xf32>, i32 -> vector<1x128xf32>
    %83 = arith.addf %81, %82 : vector<1x128xf32>
    %cst_32 = arith.constant 3.906250e-03 : f32
    %84 = vector.broadcast %cst_32 : f32 to vector<1x128xf32>
    %85 = arith.mulf %79, %84 : vector<1x128xf32>
    %cst_33 = arith.constant 3.906250e-03 : f32
    %86 = vector.broadcast %cst_33 : f32 to vector<1x128xf32>
    %87 = arith.mulf %83, %86 : vector<1x128xf32>
    %88 = arith.mulf %85, %85 : vector<1x128xf32>
    %89 = arith.subf %87, %88 : vector<1x128xf32>
    %cst_34 = arith.constant 9.99999974E-6 : f32
    %90 = vector.broadcast %cst_34 : f32 to vector<1x128xf32>
    %91 = arith.addf %89, %90 : vector<1x128xf32>
    %92 = math.rsqrt %91 : vector<1x128xf32>
    %93 = arith.mulf %8, %92 : vector<1x128xf32>
    %94 = arith.mulf %85, %93 : vector<1x128xf32>
    %95 = arith.subf %9, %94 : vector<1x128xf32>
    %c1 = arith.constant 1 : index
    %c0_35 = arith.constant 0 : index
    %96 = vector.load %arg6[%c1, %c0_35] : memref<4x128xf32, #tpu.memory_space<vmem>>, vector<1x128xf32>
    %c1_36 = arith.constant 1 : index
    %c0_37 = arith.constant 0 : index
    %97 = vector.load %arg7[%c1_36, %c0_37] : memref<4x128xf32, #tpu.memory_space<vmem>>, vector<1x128xf32>
    %cst_38 = arith.constant 0.000000e+00 : f32
    %98 = vector.broadcast %cst_38 : f32 to vector<1x128xf32>
    %cst_39 = arith.constant 0.000000e+00 : f32
    %99 = vector.broadcast %cst_39 : f32 to vector<1x128xf32>
    %100 = vector.extract_strided_slice %7 {offsets = [0, 0], sizes = [8, 128], strides = [1, 1]} : vector<64x128xf32> to vector<8x128xf32>
    %cst_40 = arith.constant dense<0.000000e+00> : vector<128xf32>
    %101 = vector.multi_reduction <add>, %100, %cst_40 [0] : vector<8x128xf32> to vector<128xf32>
    %102 = vector.shape_cast %101 : vector<128xf32> to vector<1x128xf32>
    %103 = arith.addf %98, %102 : vector<1x128xf32>
    %104 = arith.mulf %100, %100 : vector<8x128xf32>
    %cst_41 = arith.constant dense<0.000000e+00> : vector<128xf32>
    %105 = vector.multi_reduction <add>, %104, %cst_41 [0] : vector<8x128xf32> to vector<128xf32>
    %106 = vector.shape_cast %105 : vector<128xf32> to vector<1x128xf32>
    %107 = arith.addf %99, %106 : vector<1x128xf32>
    %108 = vector.extract_strided_slice %7 {offsets = [8, 0], sizes = [8, 128], strides = [1, 1]} : vector<64x128xf32> to vector<8x128xf32>
    %cst_42 = arith.constant dense<0.000000e+00> : vector<128xf32>
    %109 = vector.multi_reduction <add>, %108, %cst_42 [0] : vector<8x128xf32> to vector<128xf32>
    %110 = vector.shape_cast %109 : vector<128xf32> to vector<1x128xf32>
    %111 = arith.addf %103, %110 : vector<1x128xf32>
    %112 = arith.mulf %108, %108 : vector<8x128xf32>
    %cst_43 = arith.constant dense<0.000000e+00> : vector<128xf32>
    %113 = vector.multi_reduction <add>, %112, %cst_43 [0] : vector<8x128xf32> to vector<128xf32>
    %114 = vector.shape_cast %113 : vector<128xf32> to vector<1x128xf32>
    %115 = arith.addf %107, %114 : vector<1x128xf32>
    %116 = vector.extract_strided_slice %7 {offsets = [16, 0], sizes = [8, 128], strides = [1, 1]} : vector<64x128xf32> to vector<8x128xf32>
    %cst_44 = arith.constant dense<0.000000e+00> : vector<128xf32>
    %117 = vector.multi_reduction <add>, %116, %cst_44 [0] : vector<8x128xf32> to vector<128xf32>
    %118 = vector.shape_cast %117 : vector<128xf32> to vector<1x128xf32>
    %119 = arith.addf %111, %118 : vector<1x128xf32>
    %120 = arith.mulf %116, %116 : vector<8x128xf32>
    %cst_45 = arith.constant dense<0.000000e+00> : vector<128xf32>
    %121 = vector.multi_reduction <add>, %120, %cst_45 [0] : vector<8x128xf32> to vector<128xf32>
    %122 = vector.shape_cast %121 : vector<128xf32> to vector<1x128xf32>
    %123 = arith.addf %115, %122 : vector<1x128xf32>
    %124 = vector.extract_strided_slice %7 {offsets = [24, 0], sizes = [8, 128], strides = [1, 1]} : vector<64x128xf32> to vector<8x128xf32>
    %cst_46 = arith.constant dense<0.000000e+00> : vector<128xf32>
    %125 = vector.multi_reduction <add>, %124, %cst_46 [0] : vector<8x128xf32> to vector<128xf32>
    %126 = vector.shape_cast %125 : vector<128xf32> to vector<1x128xf32>
    %127 = arith.addf %119, %126 : vector<1x128xf32>
    %128 = arith.mulf %124, %124 : vector<8x128xf32>
    %cst_47 = arith.constant dense<0.000000e+00> : vector<128xf32>
    %129 = vector.multi_reduction <add>, %128, %cst_47 [0] : vector<8x128xf32> to vector<128xf32>
    %130 = vector.shape_cast %129 : vector<128xf32> to vector<1x128xf32>
    %131 = arith.addf %123, %130 : vector<1x128xf32>
    %132 = vector.extract_strided_slice %7 {offsets = [32, 0], sizes = [8, 128], strides = [1, 1]} : vector<64x128xf32> to vector<8x128xf32>
    %cst_48 = arith.constant dense<0.000000e+00> : vector<128xf32>
    %133 = vector.multi_reduction <add>, %132, %cst_48 [0] : vector<8x128xf32> to vector<128xf32>
    %134 = vector.shape_cast %133 : vector<128xf32> to vector<1x128xf32>
    %135 = arith.addf %127, %134 : vector<1x128xf32>
    %136 = arith.mulf %132, %132 : vector<8x128xf32>
    %cst_49 = arith.constant dense<0.000000e+00> : vector<128xf32>
    %137 = vector.multi_reduction <add>, %136, %cst_49 [0] : vector<8x128xf32> to vector<128xf32>
    %138 = vector.shape_cast %137 : vector<128xf32> to vector<1x128xf32>
    %139 = arith.addf %131, %138 : vector<1x128xf32>
    %140 = vector.extract_strided_slice %7 {offsets = [40, 0], sizes = [8, 128], strides = [1, 1]} : vector<64x128xf32> to vector<8x128xf32>
    %cst_50 = arith.constant dense<0.000000e+00> : vector<128xf32>
    %141 = vector.multi_reduction <add>, %140, %cst_50 [0] : vector<8x128xf32> to vector<128xf32>
    %142 = vector.shape_cast %141 : vector<128xf32> to vector<1x128xf32>
    %143 = arith.addf %135, %142 : vector<1x128xf32>
    %144 = arith.mulf %140, %140 : vector<8x128xf32>
    %cst_51 = arith.constant dense<0.000000e+00> : vector<128xf32>
    %145 = vector.multi_reduction <add>, %144, %cst_51 [0] : vector<8x128xf32> to vector<128xf32>
    %146 = vector.shape_cast %145 : vector<128xf32> to vector<1x128xf32>
    %147 = arith.addf %139, %146 : vector<1x128xf32>
    %148 = vector.extract_strided_slice %7 {offsets = [48, 0], sizes = [8, 128], strides = [1, 1]} : vector<64x128xf32> to vector<8x128xf32>
    %cst_52 = arith.constant dense<0.000000e+00> : vector<128xf32>
    %149 = vector.multi_reduction <add>, %148, %cst_52 [0] : vector<8x128xf32> to vector<128xf32>
    %150 = vector.shape_cast %149 : vector<128xf32> to vector<1x128xf32>
    %151 = arith.addf %143, %150 : vector<1x128xf32>
    %152 = arith.mulf %148, %148 : vector<8x128xf32>
    %cst_53 = arith.constant dense<0.000000e+00> : vector<128xf32>
    %153 = vector.multi_reduction <add>, %152, %cst_53 [0] : vector<8x128xf32> to vector<128xf32>
    %154 = vector.shape_cast %153 : vector<128xf32> to vector<1x128xf32>
    %155 = arith.addf %147, %154 : vector<1x128xf32>
    %156 = vector.extract_strided_slice %7 {offsets = [56, 0], sizes = [8, 128], strides = [1, 1]} : vector<64x128xf32> to vector<8x128xf32>
    %cst_54 = arith.constant dense<0.000000e+00> : vector<128xf32>
    %157 = vector.multi_reduction <add>, %156, %cst_54 [0] : vector<8x128xf32> to vector<128xf32>
    %158 = vector.shape_cast %157 : vector<128xf32> to vector<1x128xf32>
    %159 = arith.addf %151, %158 : vector<1x128xf32>
    %160 = arith.mulf %156, %156 : vector<8x128xf32>
    %cst_55 = arith.constant dense<0.000000e+00> : vector<128xf32>
    %161 = vector.multi_reduction <add>, %160, %cst_55 [0] : vector<8x128xf32> to vector<128xf32>
    %162 = vector.shape_cast %161 : vector<128xf32> to vector<1x128xf32>
    %163 = arith.addf %155, %162 : vector<1x128xf32>
    %c64_i32_56 = arith.constant 64 : i32
    %164 = tpu.dynamic_rotate %159 by %c64_i32_56 dim 1 : vector<1x128xf32>, i32 -> vector<1x128xf32>
    %165 = arith.addf %159, %164 : vector<1x128xf32>
    %c32_i32_57 = arith.constant 32 : i32
    %166 = tpu.dynamic_rotate %165 by %c32_i32_57 dim 1 : vector<1x128xf32>, i32 -> vector<1x128xf32>
    %167 = arith.addf %165, %166 : vector<1x128xf32>
    %c64_i32_58 = arith.constant 64 : i32
    %168 = tpu.dynamic_rotate %163 by %c64_i32_58 dim 1 : vector<1x128xf32>, i32 -> vector<1x128xf32>
    %169 = arith.addf %163, %168 : vector<1x128xf32>
    %c32_i32_59 = arith.constant 32 : i32
    %170 = tpu.dynamic_rotate %169 by %c32_i32_59 dim 1 : vector<1x128xf32>, i32 -> vector<1x128xf32>
    %171 = arith.addf %169, %170 : vector<1x128xf32>
    %cst_60 = arith.constant 3.906250e-03 : f32
    %172 = vector.broadcast %cst_60 : f32 to vector<1x128xf32>
    %173 = arith.mulf %167, %172 : vector<1x128xf32>
    %cst_61 = arith.constant 3.906250e-03 : f32
    %174 = vector.broadcast %cst_61 : f32 to vector<1x128xf32>
    %175 = arith.mulf %171, %174 : vector<1x128xf32>
    %176 = arith.mulf %173, %173 : vector<1x128xf32>
    %177 = arith.subf %175, %176 : vector<1x128xf32>
    %cst_62 = arith.constant 9.99999974E-6 : f32
    %178 = vector.broadcast %cst_62 : f32 to vector<1x128xf32>
    %179 = arith.addf %177, %178 : vector<1x128xf32>
    %180 = math.rsqrt %179 : vector<1x128xf32>
    %181 = arith.mulf %96, %180 : vector<1x128xf32>
    %182 = arith.mulf %173, %181 : vector<1x128xf32>
    %183 = arith.subf %97, %182 : vector<1x128xf32>
    %184 = vector.broadcast %93 : vector<1x128xf32> to vector<64x128xf32>
    %185 = arith.mulf %4, %184 : vector<64x128xf32>
    %186 = vector.broadcast %181 : vector<1x128xf32> to vector<64x128xf32>
    %187 = arith.mulf %7, %186 : vector<64x128xf32>
    %188 = arith.addf %185, %187 : vector<64x128xf32>
    %189 = arith.addf %95, %183 : vector<1x128xf32>
    %190 = vector.broadcast %189 : vector<1x128xf32> to vector<64x128xf32>
    %191 = arith.addf %188, %190 : vector<64x128xf32>
    %cst_63 = arith.constant 0.000000e+00 : f32
    %192 = vector.broadcast %cst_63 : f32 to vector<64x128xf32>
    %193 = arith.subf %192, %191 : vector<64x128xf32>
    %194 = math.exp %193 : vector<64x128xf32>
    %cst_64 = arith.constant 1.000000e+00 : f32
    %195 = vector.broadcast %cst_64 : f32 to vector<64x128xf32>
    %196 = arith.addf %195, %194 : vector<64x128xf32>
    %197 = tpu.reciprocal %196 {approx = true} : vector<64x128xf32> -> vector<64x128xf32>
    %198 = arith.subf %0, %1 : vector<64x128xf32>
    %199 = arith.mulf %197, %198 : vector<64x128xf32>
    %200 = arith.addf %1, %199 : vector<64x128xf32>
    %201 = arith.truncf %200 : vector<64x128xf32> to vector<64x128xbf16>
    %c0_65 = arith.constant 0 : index
    %c0_66 = arith.constant 0 : index
    %202 = vector.load %arg4[%c0_65, %c0_66] : memref<128x128xbf16, #tpu.memory_space<vmem>>, vector<128x128xbf16>
    %cst_67 = arith.constant dense<0.000000e+00> : vector<64x128xf32>
    %203 = tpu.matmul %201, %202, %cst_67 {dimension_numbers = #tpu.dot_dimension_numbers<[1], [0], [0], [1], [0, 0, 1, 1], [], []>} : vector<64x128xbf16>, vector<128x128xbf16>, vector<64x128xf32> -> vector<64x128xf32>
    %c2 = arith.constant 2 : index
    %c0_68 = arith.constant 0 : index
    %204 = vector.load %arg6[%c2, %c0_68] : memref<4x128xf32, #tpu.memory_space<vmem>>, vector<1x128xf32>
    %c2_69 = arith.constant 2 : index
    %c0_70 = arith.constant 0 : index
    %205 = vector.load %arg7[%c2_69, %c0_70] : memref<4x128xf32, #tpu.memory_space<vmem>>, vector<1x128xf32>
    %cst_71 = arith.constant 0.000000e+00 : f32
    %206 = vector.broadcast %cst_71 : f32 to vector<1x128xf32>
    %cst_72 = arith.constant 0.000000e+00 : f32
    %207 = vector.broadcast %cst_72 : f32 to vector<1x128xf32>
    %208 = vector.extract_strided_slice %203 {offsets = [0, 0], sizes = [8, 128], strides = [1, 1]} : vector<64x128xf32> to vector<8x128xf32>
    %cst_73 = arith.constant dense<0.000000e+00> : vector<128xf32>
    %209 = vector.multi_reduction <add>, %208, %cst_73 [0] : vector<8x128xf32> to vector<128xf32>
    %210 = vector.shape_cast %209 : vector<128xf32> to vector<1x128xf32>
    %211 = arith.addf %206, %210 : vector<1x128xf32>
    %212 = arith.mulf %208, %208 : vector<8x128xf32>
    %cst_74 = arith.constant dense<0.000000e+00> : vector<128xf32>
    %213 = vector.multi_reduction <add>, %212, %cst_74 [0] : vector<8x128xf32> to vector<128xf32>
    %214 = vector.shape_cast %213 : vector<128xf32> to vector<1x128xf32>
    %215 = arith.addf %207, %214 : vector<1x128xf32>
    %216 = vector.extract_strided_slice %203 {offsets = [8, 0], sizes = [8, 128], strides = [1, 1]} : vector<64x128xf32> to vector<8x128xf32>
    %cst_75 = arith.constant dense<0.000000e+00> : vector<128xf32>
    %217 = vector.multi_reduction <add>, %216, %cst_75 [0] : vector<8x128xf32> to vector<128xf32>
    %218 = vector.shape_cast %217 : vector<128xf32> to vector<1x128xf32>
    %219 = arith.addf %211, %218 : vector<1x128xf32>
    %220 = arith.mulf %216, %216 : vector<8x128xf32>
    %cst_76 = arith.constant dense<0.000000e+00> : vector<128xf32>
    %221 = vector.multi_reduction <add>, %220, %cst_76 [0] : vector<8x128xf32> to vector<128xf32>
    %222 = vector.shape_cast %221 : vector<128xf32> to vector<1x128xf32>
    %223 = arith.addf %215, %222 : vector<1x128xf32>
    %224 = vector.extract_strided_slice %203 {offsets = [16, 0], sizes = [8, 128], strides = [1, 1]} : vector<64x128xf32> to vector<8x128xf32>
    %cst_77 = arith.constant dense<0.000000e+00> : vector<128xf32>
    %225 = vector.multi_reduction <add>, %224, %cst_77 [0] : vector<8x128xf32> to vector<128xf32>
    %226 = vector.shape_cast %225 : vector<128xf32> to vector<1x128xf32>
    %227 = arith.addf %219, %226 : vector<1x128xf32>
    %228 = arith.mulf %224, %224 : vector<8x128xf32>
    %cst_78 = arith.constant dense<0.000000e+00> : vector<128xf32>
    %229 = vector.multi_reduction <add>, %228, %cst_78 [0] : vector<8x128xf32> to vector<128xf32>
    %230 = vector.shape_cast %229 : vector<128xf32> to vector<1x128xf32>
    %231 = arith.addf %223, %230 : vector<1x128xf32>
    %232 = vector.extract_strided_slice %203 {offsets = [24, 0], sizes = [8, 128], strides = [1, 1]} : vector<64x128xf32> to vector<8x128xf32>
    %cst_79 = arith.constant dense<0.000000e+00> : vector<128xf32>
    %233 = vector.multi_reduction <add>, %232, %cst_79 [0] : vector<8x128xf32> to vector<128xf32>
    %234 = vector.shape_cast %233 : vector<128xf32> to vector<1x128xf32>
    %235 = arith.addf %227, %234 : vector<1x128xf32>
    %236 = arith.mulf %232, %232 : vector<8x128xf32>
    %cst_80 = arith.constant dense<0.000000e+00> : vector<128xf32>
    %237 = vector.multi_reduction <add>, %236, %cst_80 [0] : vector<8x128xf32> to vector<128xf32>
    %238 = vector.shape_cast %237 : vector<128xf32> to vector<1x128xf32>
    %239 = arith.addf %231, %238 : vector<1x128xf32>
    %240 = vector.extract_strided_slice %203 {offsets = [32, 0], sizes = [8, 128], strides = [1, 1]} : vector<64x128xf32> to vector<8x128xf32>
    %cst_81 = arith.constant dense<0.000000e+00> : vector<128xf32>
    %241 = vector.multi_reduction <add>, %240, %cst_81 [0] : vector<8x128xf32> to vector<128xf32>
    %242 = vector.shape_cast %241 : vector<128xf32> to vector<1x128xf32>
    %243 = arith.addf %235, %242 : vector<1x128xf32>
    %244 = arith.mulf %240, %240 : vector<8x128xf32>
    %cst_82 = arith.constant dense<0.000000e+00> : vector<128xf32>
    %245 = vector.multi_reduction <add>, %244, %cst_82 [0] : vector<8x128xf32> to vector<128xf32>
    %246 = vector.shape_cast %245 : vector<128xf32> to vector<1x128xf32>
    %247 = arith.addf %239, %246 : vector<1x128xf32>
    %248 = vector.extract_strided_slice %203 {offsets = [40, 0], sizes = [8, 128], strides = [1, 1]} : vector<64x128xf32> to vector<8x128xf32>
    %cst_83 = arith.constant dense<0.000000e+00> : vector<128xf32>
    %249 = vector.multi_reduction <add>, %248, %cst_83 [0] : vector<8x128xf32> to vector<128xf32>
    %250 = vector.shape_cast %249 : vector<128xf32> to vector<1x128xf32>
    %251 = arith.addf %243, %250 : vector<1x128xf32>
    %252 = arith.mulf %248, %248 : vector<8x128xf32>
    %cst_84 = arith.constant dense<0.000000e+00> : vector<128xf32>
    %253 = vector.multi_reduction <add>, %252, %cst_84 [0] : vector<8x128xf32> to vector<128xf32>
    %254 = vector.shape_cast %253 : vector<128xf32> to vector<1x128xf32>
    %255 = arith.addf %247, %254 : vector<1x128xf32>
    %256 = vector.extract_strided_slice %203 {offsets = [48, 0], sizes = [8, 128], strides = [1, 1]} : vector<64x128xf32> to vector<8x128xf32>
    %cst_85 = arith.constant dense<0.000000e+00> : vector<128xf32>
    %257 = vector.multi_reduction <add>, %256, %cst_85 [0] : vector<8x128xf32> to vector<128xf32>
    %258 = vector.shape_cast %257 : vector<128xf32> to vector<1x128xf32>
    %259 = arith.addf %251, %258 : vector<1x128xf32>
    %260 = arith.mulf %256, %256 : vector<8x128xf32>
    %cst_86 = arith.constant dense<0.000000e+00> : vector<128xf32>
    %261 = vector.multi_reduction <add>, %260, %cst_86 [0] : vector<8x128xf32> to vector<128xf32>
    %262 = vector.shape_cast %261 : vector<128xf32> to vector<1x128xf32>
    %263 = arith.addf %255, %262 : vector<1x128xf32>
    %264 = vector.extract_strided_slice %203 {offsets = [56, 0], sizes = [8, 128], strides = [1, 1]} : vector<64x128xf32> to vector<8x128xf32>
    %cst_87 = arith.constant dense<0.000000e+00> : vector<128xf32>
    %265 = vector.multi_reduction <add>, %264, %cst_87 [0] : vector<8x128xf32> to vector<128xf32>
    %266 = vector.shape_cast %265 : vector<128xf32> to vector<1x128xf32>
    %267 = arith.addf %259, %266 : vector<1x128xf32>
    %268 = arith.mulf %264, %264 : vector<8x128xf32>
    %cst_88 = arith.constant dense<0.000000e+00> : vector<128xf32>
    %269 = vector.multi_reduction <add>, %268, %cst_88 [0] : vector<8x128xf32> to vector<128xf32>
    %270 = vector.shape_cast %269 : vector<128xf32> to vector<1x128xf32>
    %271 = arith.addf %263, %270 : vector<1x128xf32>
    %c64_i32_89 = arith.constant 64 : i32
    %272 = tpu.dynamic_rotate %267 by %c64_i32_89 dim 1 : vector<1x128xf32>, i32 -> vector<1x128xf32>
    %273 = arith.addf %267, %272 : vector<1x128xf32>
    %c32_i32_90 = arith.constant 32 : i32
    %274 = tpu.dynamic_rotate %273 by %c32_i32_90 dim 1 : vector<1x128xf32>, i32 -> vector<1x128xf32>
    %275 = arith.addf %273, %274 : vector<1x128xf32>
    %c64_i32_91 = arith.constant 64 : i32
    %276 = tpu.dynamic_rotate %271 by %c64_i32_91 dim 1 : vector<1x128xf32>, i32 -> vector<1x128xf32>
    %277 = arith.addf %271, %276 : vector<1x128xf32>
    %c32_i32_92 = arith.constant 32 : i32
    %278 = tpu.dynamic_rotate %277 by %c32_i32_92 dim 1 : vector<1x128xf32>, i32 -> vector<1x128xf32>
    %279 = arith.addf %277, %278 : vector<1x128xf32>
    %cst_93 = arith.constant 3.906250e-03 : f32
    %280 = vector.broadcast %cst_93 : f32 to vector<1x128xf32>
    %281 = arith.mulf %275, %280 : vector<1x128xf32>
    %cst_94 = arith.constant 3.906250e-03 : f32
    %282 = vector.broadcast %cst_94 : f32 to vector<1x128xf32>
    %283 = arith.mulf %279, %282 : vector<1x128xf32>
    %284 = arith.mulf %281, %281 : vector<1x128xf32>
    %285 = arith.subf %283, %284 : vector<1x128xf32>
    %cst_95 = arith.constant 9.99999974E-6 : f32
    %286 = vector.broadcast %cst_95 : f32 to vector<1x128xf32>
    %287 = arith.addf %285, %286 : vector<1x128xf32>
    %288 = math.rsqrt %287 : vector<1x128xf32>
    %289 = arith.mulf %204, %288 : vector<1x128xf32>
    %290 = arith.mulf %281, %289 : vector<1x128xf32>
    %291 = arith.subf %205, %290 : vector<1x128xf32>
    %292 = vector.broadcast %289 : vector<1x128xf32> to vector<64x128xf32>
    %293 = arith.mulf %203, %292 : vector<64x128xf32>
    %294 = vector.broadcast %291 : vector<1x128xf32> to vector<64x128xf32>
    %295 = arith.addf %293, %294 : vector<64x128xf32>
    %cst_96 = arith.constant 0.000000e+00 : f32
    %296 = vector.broadcast %cst_96 : f32 to vector<64x128xf32>
    %297 = arith.maximumf %295, %296 : vector<64x128xf32>
    %298 = arith.truncf %297 : vector<64x128xf32> to vector<64x128xbf16>
    %c0_97 = arith.constant 0 : index
    %c0_98 = arith.constant 0 : index
    %299 = vector.load %arg5[%c0_97, %c0_98] : memref<128x128xbf16, #tpu.memory_space<vmem>>, vector<128x128xbf16>
    %cst_99 = arith.constant dense<0.000000e+00> : vector<64x128xf32>
    %300 = tpu.matmul %298, %299, %cst_99 {dimension_numbers = #tpu.dot_dimension_numbers<[1], [0], [0], [1], [0, 0, 1, 1], [], []>} : vector<64x128xbf16>, vector<128x128xbf16>, vector<64x128xf32> -> vector<64x128xf32>
    %cst_100 = arith.constant 0.000000e+00 : f32
    %301 = vector.broadcast %cst_100 : f32 to vector<1x128xf32>
    %cst_101 = arith.constant 0.000000e+00 : f32
    %302 = vector.broadcast %cst_101 : f32 to vector<1x128xf32>
    %303 = vector.extract_strided_slice %300 {offsets = [0, 0], sizes = [8, 128], strides = [1, 1]} : vector<64x128xf32> to vector<8x128xf32>
    %cst_102 = arith.constant dense<0.000000e+00> : vector<128xf32>
    %304 = vector.multi_reduction <add>, %303, %cst_102 [0] : vector<8x128xf32> to vector<128xf32>
    %305 = vector.shape_cast %304 : vector<128xf32> to vector<1x128xf32>
    %306 = arith.addf %301, %305 : vector<1x128xf32>
    %307 = arith.mulf %303, %303 : vector<8x128xf32>
    %cst_103 = arith.constant dense<0.000000e+00> : vector<128xf32>
    %308 = vector.multi_reduction <add>, %307, %cst_103 [0] : vector<8x128xf32> to vector<128xf32>
    %309 = vector.shape_cast %308 : vector<128xf32> to vector<1x128xf32>
    %310 = arith.addf %302, %309 : vector<1x128xf32>
    %311 = vector.extract_strided_slice %300 {offsets = [8, 0], sizes = [8, 128], strides = [1, 1]} : vector<64x128xf32> to vector<8x128xf32>
    %cst_104 = arith.constant dense<0.000000e+00> : vector<128xf32>
    %312 = vector.multi_reduction <add>, %311, %cst_104 [0] : vector<8x128xf32> to vector<128xf32>
    %313 = vector.shape_cast %312 : vector<128xf32> to vector<1x128xf32>
    %314 = arith.addf %306, %313 : vector<1x128xf32>
    %315 = arith.mulf %311, %311 : vector<8x128xf32>
    %cst_105 = arith.constant dense<0.000000e+00> : vector<128xf32>
    %316 = vector.multi_reduction <add>, %315, %cst_105 [0] : vector<8x128xf32> to vector<128xf32>
    %317 = vector.shape_cast %316 : vector<128xf32> to vector<1x128xf32>
    %318 = arith.addf %310, %317 : vector<1x128xf32>
    %319 = vector.extract_strided_slice %300 {offsets = [16, 0], sizes = [8, 128], strides = [1, 1]} : vector<64x128xf32> to vector<8x128xf32>
    %cst_106 = arith.constant dense<0.000000e+00> : vector<128xf32>
    %320 = vector.multi_reduction <add>, %319, %cst_106 [0] : vector<8x128xf32> to vector<128xf32>
    %321 = vector.shape_cast %320 : vector<128xf32> to vector<1x128xf32>
    %322 = arith.addf %314, %321 : vector<1x128xf32>
    %323 = arith.mulf %319, %319 : vector<8x128xf32>
    %cst_107 = arith.constant dense<0.000000e+00> : vector<128xf32>
    %324 = vector.multi_reduction <add>, %323, %cst_107 [0] : vector<8x128xf32> to vector<128xf32>
    %325 = vector.shape_cast %324 : vector<128xf32> to vector<1x128xf32>
    %326 = arith.addf %318, %325 : vector<1x128xf32>
    %327 = vector.extract_strided_slice %300 {offsets = [24, 0], sizes = [8, 128], strides = [1, 1]} : vector<64x128xf32> to vector<8x128xf32>
    %cst_108 = arith.constant dense<0.000000e+00> : vector<128xf32>
    %328 = vector.multi_reduction <add>, %327, %cst_108 [0] : vector<8x128xf32> to vector<128xf32>
    %329 = vector.shape_cast %328 : vector<128xf32> to vector<1x128xf32>
    %330 = arith.addf %322, %329 : vector<1x128xf32>
    %331 = arith.mulf %327, %327 : vector<8x128xf32>
    %cst_109 = arith.constant dense<0.000000e+00> : vector<128xf32>
    %332 = vector.multi_reduction <add>, %331, %cst_109 [0] : vector<8x128xf32> to vector<128xf32>
    %333 = vector.shape_cast %332 : vector<128xf32> to vector<1x128xf32>
    %334 = arith.addf %326, %333 : vector<1x128xf32>
    %335 = vector.extract_strided_slice %300 {offsets = [32, 0], sizes = [8, 128], strides = [1, 1]} : vector<64x128xf32> to vector<8x128xf32>
    %cst_110 = arith.constant dense<0.000000e+00> : vector<128xf32>
    %336 = vector.multi_reduction <add>, %335, %cst_110 [0] : vector<8x128xf32> to vector<128xf32>
    %337 = vector.shape_cast %336 : vector<128xf32> to vector<1x128xf32>
    %338 = arith.addf %330, %337 : vector<1x128xf32>
    %339 = arith.mulf %335, %335 : vector<8x128xf32>
    %cst_111 = arith.constant dense<0.000000e+00> : vector<128xf32>
    %340 = vector.multi_reduction <add>, %339, %cst_111 [0] : vector<8x128xf32> to vector<128xf32>
    %341 = vector.shape_cast %340 : vector<128xf32> to vector<1x128xf32>
    %342 = arith.addf %334, %341 : vector<1x128xf32>
    %343 = vector.extract_strided_slice %300 {offsets = [40, 0], sizes = [8, 128], strides = [1, 1]} : vector<64x128xf32> to vector<8x128xf32>
    %cst_112 = arith.constant dense<0.000000e+00> : vector<128xf32>
    %344 = vector.multi_reduction <add>, %343, %cst_112 [0] : vector<8x128xf32> to vector<128xf32>
    %345 = vector.shape_cast %344 : vector<128xf32> to vector<1x128xf32>
    %346 = arith.addf %338, %345 : vector<1x128xf32>
    %347 = arith.mulf %343, %343 : vector<8x128xf32>
    %cst_113 = arith.constant dense<0.000000e+00> : vector<128xf32>
    %348 = vector.multi_reduction <add>, %347, %cst_113 [0] : vector<8x128xf32> to vector<128xf32>
    %349 = vector.shape_cast %348 : vector<128xf32> to vector<1x128xf32>
    %350 = arith.addf %342, %349 : vector<1x128xf32>
    %351 = vector.extract_strided_slice %300 {offsets = [48, 0], sizes = [8, 128], strides = [1, 1]} : vector<64x128xf32> to vector<8x128xf32>
    %cst_114 = arith.constant dense<0.000000e+00> : vector<128xf32>
    %352 = vector.multi_reduction <add>, %351, %cst_114 [0] : vector<8x128xf32> to vector<128xf32>
    %353 = vector.shape_cast %352 : vector<128xf32> to vector<1x128xf32>
    %354 = arith.addf %346, %353 : vector<1x128xf32>
    %355 = arith.mulf %351, %351 : vector<8x128xf32>
    %cst_115 = arith.constant dense<0.000000e+00> : vector<128xf32>
    %356 = vector.multi_reduction <add>, %355, %cst_115 [0] : vector<8x128xf32> to vector<128xf32>
    %357 = vector.shape_cast %356 : vector<128xf32> to vector<1x128xf32>
    %358 = arith.addf %350, %357 : vector<1x128xf32>
    %359 = vector.extract_strided_slice %300 {offsets = [56, 0], sizes = [8, 128], strides = [1, 1]} : vector<64x128xf32> to vector<8x128xf32>
    %cst_116 = arith.constant dense<0.000000e+00> : vector<128xf32>
    %360 = vector.multi_reduction <add>, %359, %cst_116 [0] : vector<8x128xf32> to vector<128xf32>
    %361 = vector.shape_cast %360 : vector<128xf32> to vector<1x128xf32>
    %362 = arith.addf %354, %361 : vector<1x128xf32>
    %363 = arith.mulf %359, %359 : vector<8x128xf32>
    %cst_117 = arith.constant dense<0.000000e+00> : vector<128xf32>
    %364 = vector.multi_reduction <add>, %363, %cst_117 [0] : vector<8x128xf32> to vector<128xf32>
    %365 = vector.shape_cast %364 : vector<128xf32> to vector<1x128xf32>
    %366 = arith.addf %358, %365 : vector<1x128xf32>
    %c64_i32_118 = arith.constant 64 : i32
    %367 = tpu.dynamic_rotate %362 by %c64_i32_118 dim 1 : vector<1x128xf32>, i32 -> vector<1x128xf32>
    %368 = arith.addf %362, %367 : vector<1x128xf32>
    %c32_i32_119 = arith.constant 32 : i32
    %369 = tpu.dynamic_rotate %368 by %c32_i32_119 dim 1 : vector<1x128xf32>, i32 -> vector<1x128xf32>
    %370 = arith.addf %368, %369 : vector<1x128xf32>
    %c64_i32_120 = arith.constant 64 : i32
    %371 = tpu.dynamic_rotate %366 by %c64_i32_120 dim 1 : vector<1x128xf32>, i32 -> vector<1x128xf32>
    %372 = arith.addf %366, %371 : vector<1x128xf32>
    %c32_i32_121 = arith.constant 32 : i32
    %373 = tpu.dynamic_rotate %372 by %c32_i32_121 dim 1 : vector<1x128xf32>, i32 -> vector<1x128xf32>
    %374 = arith.addf %372, %373 : vector<1x128xf32>
    %cst_122 = arith.constant 3.906250e-03 : f32
    %375 = vector.broadcast %cst_122 : f32 to vector<1x128xf32>
    %376 = arith.mulf %370, %375 : vector<1x128xf32>
    %cst_123 = arith.constant 3.906250e-03 : f32
    %377 = vector.broadcast %cst_123 : f32 to vector<1x128xf32>
    %378 = arith.mulf %374, %377 : vector<1x128xf32>
    %379 = arith.mulf %376, %376 : vector<1x128xf32>
    %380 = arith.subf %378, %379 : vector<1x128xf32>
    %c3 = arith.constant 3 : index
    %c0_124 = arith.constant 0 : index
    %381 = vector.load %arg6[%c3, %c0_124] : memref<4x128xf32, #tpu.memory_space<vmem>>, vector<1x128xf32>
    %cst_125 = arith.constant 9.99999974E-6 : f32
    %382 = vector.broadcast %cst_125 : f32 to vector<1x128xf32>
    %383 = arith.addf %380, %382 : vector<1x128xf32>
    %384 = math.rsqrt %383 : vector<1x128xf32>
    %385 = arith.mulf %381, %384 : vector<1x128xf32>
    %c3_126 = arith.constant 3 : index
    %c0_127 = arith.constant 0 : index
    %386 = vector.load %arg7[%c3_126, %c0_127] : memref<4x128xf32, #tpu.memory_space<vmem>>, vector<1x128xf32>
    %387 = arith.mulf %376, %385 : vector<1x128xf32>
    %388 = arith.subf %386, %387 : vector<1x128xf32>
    %389 = vector.broadcast %385 : vector<1x128xf32> to vector<64x128xf32>
    %390 = arith.mulf %300, %389 : vector<64x128xf32>
    %391 = vector.broadcast %388 : vector<1x128xf32> to vector<64x128xf32>
    %392 = arith.addf %390, %391 : vector<64x128xf32>
    %c0_128 = arith.constant 0 : index
    %c0_129 = arith.constant 0 : index
    %393 = vector.load %arg8[%c0_128, %c0_129] : memref<64x128xf32, #tpu.memory_space<vmem>>, vector<64x128xf32>
    tpu.vector_store %arg8[%c0_128, %c0_129], %392 {strides = array<i32>} : memref<64x128xf32, #tpu.memory_space<vmem>>, vector<64x128xf32>,
    return
  }
}

</mosaic_0001>

<bundles_post_ra>
// kernel: tpu_custom_call.1
= control target key start
LH: loop header
LB: loop body
LE: loop exit
PB: predicated region body
PF: predicated region fallthrough
CT: control target
= control target key end

     0   :  { %13 = vsyncpa [#allocation3], 0  ;;  %s2356_s0 = inlined_call_operand.hbm [shape: f32[64,128], index: 0, kind: input, shape index: {}]   ;;  %s2357_s1 = inlined_call_operand.hbm [shape: f32[64,128], index: 1, kind: input, shape index: {}]   ;;  %s2358_s2 = inlined_call_operand.hbm [shape: bf16[128,128], index: 2, kind: input, shape index: {}]   ;;  %s2359_s3 = inlined_call_operand.hbm [shape: bf16[128,128], index: 3, kind: input, shape index: {}]   ;;  %s2360_s4 = inlined_call_operand.hbm [shape: bf16[128,128], index: 4, kind: input, shape index: {}]   ;;  %s2361_s5 = inlined_call_operand.hbm [shape: bf16[128,128], index: 5, kind: input, shape index: {}]   ;;  %s2362_s6 = inlined_call_operand.vmem [shape: f32[4,128], index: 6, kind: input, shape index: {}]   ;;  %s2363_s7 = inlined_call_operand.vmem [shape: f32[4,128], index: 7, kind: input, shape index: {}]   ;;  %s2364_s8 = inlined_call_operand.hbm [shape: f32[64,128], index: 8, kind: output, shape index: {}]  }
   0x1   :  { %14 = vsyncpa [#allocation6], 0 }
   0x2   :  { %15 = vsyncpa [#allocation9], 0 }
   0x3   :  { %16 = vsyncpa [#allocation12], 0 }
   0x4   :  { %17 = vsyncpa [#allocation4], 0  ;;  %s1836_s27 = smov [#allocation5]  }
   0x5   :  { %s35_s28 = sshll.u32 %s1836_s27, 4  ;;  %s36_s28 = int_to_ptr.vmem [resolvable:$true] %s35_s28 }
   0x6   :  { %s1694_s29 = scalar_lea.vmem %s36_s28, 1024  ;;  %p1699_p1 = scmp.lt.s32.totalorder %s36_s28, %s36_s28 }
   0x7   :  { %p1695_p0 = scmp.ne.s32.totalorder %s36_s28, %s1694_s29  ;;  %p1700_p2 = scmp.lt.s32.totalorder %s1694_s29, %s1694_s29 }
   0x9   :  { %p1701_p3 = por %p1700_p2, %p1699_p1 }
   0xb   :  { %p1702_p4 = pnand %p1701_p3, %p1695_p0 }
   0xd   :  { %1705 = shalt.err (!%p1702_p4)
}
   0xe   :  { %s1837_s30 = smov 128   ;;  %s1838_s9 = smov 8  }
   0xf   :  { %41 = dma.hbm_to_vmem [thread:$0]  %s2357_s1, 1024, %s36_s28, [#allocation6], %s1837_s30, %s1837_s30, %s1838_s9  }
  0x10   :  { %s1839_s12 = smov [#allocation8]   ;;  %s1840_s14 = smov [#allocation2]  }
  0x11   :  { %s59_s13 = sshll.u32 %s1839_s12, 4  ;;  %s23_s15 = sshll.u32 %s1840_s14, 4  ;;  %s60_s13 = int_to_ptr.vmem [resolvable:$true] %s59_s13  ;;  %s24_s15 = int_to_ptr.vmem [resolvable:$true] %s23_s15 }
  0x12   :  { %s1714_s16 = scalar_lea.vmem %s60_s13, 1024  ;;  %p1719_p6 = scmp.lt.s32.totalorder %s60_s13, %s60_s13 }
  0x13   :  { %p1715_p5 = scmp.ne.s32.totalorder %s60_s13, %s1714_s16  ;;  %p1720_p7 = scmp.lt.s32.totalorder %s1714_s16, %s1714_s16 }
  0x15   :  { %p1721_p8 = por %p1720_p7, %p1719_p6 }
  0x17   :  { %p1722_p9 = pnand %p1721_p8, %p1715_p5 }
  0x19   :  { %1725 = shalt.err (!%p1722_p9)
}
  0x1a   :  { %s1841_s17 = smov 64   ;;  %s1842_s18 = smov 4  }
  0x1b   :  { %65 = dma.hbm_to_vmem [thread:$0]  %s2359_s3, 1024, %s60_s13, [#allocation9], %s1841_s17, %s1841_s17, %s1842_s18  }
  0x1c   :  { %s1734_s1 = scalar_lea.vmem %s24_s15, 1024  ;;  %p1739_p11 = scmp.lt.s32.totalorder %s24_s15, %s24_s15 }
  0x1d   :  { %p1735_p10 = scmp.ne.s32.totalorder %s24_s15, %s1734_s1  ;;  %p1740_p12 = scmp.lt.s32.totalorder %s1734_s1, %s1734_s1 }
  0x1f   :  { %p1741_p13 = por %p1740_p12, %p1739_p11 }
  0x21   :  { %p1742_p0 = pnand %p1741_p13, %p1735_p10 }
  0x23   :  { %1745 = shalt.err (!%p1742_p0)
}
  0x24   :  { %29 = dma.hbm_to_vmem [thread:$0]  %s2356_s0, 1024, %s24_s15, [#allocation3], %s1837_s30, %s1837_s30, %s1838_s9  }
  0x25   :  { %s1843_s23 = smov [#allocation7]   ;;  %s1844_s25 = smov [#allocation10]  }
  0x26   :  { %s47_s24 = sshll.u32 %s1843_s23, 4  ;;  %s71_s3 = sshll.u32 %s1844_s25, 4  ;;  %s48_s24 = int_to_ptr.vmem [resolvable:$true] %s47_s24  ;;  %s72_s3 = int_to_ptr.vmem [resolvable:$true] %s71_s3 }
  0x27   :  { %s1754_s26 = scalar_lea.vmem %s48_s24, 1024  ;;  %p1759_p2 = scmp.lt.s32.totalorder %s48_s24, %s48_s24 }
  0x28   :  { %p1755_p1 = scmp.ne.s32.totalorder %s48_s24, %s1754_s26  ;;  %p1760_p3 = scmp.lt.s32.totalorder %s1754_s26, %s1754_s26 }
  0x2a   :  { %p1761_p4 = por %p1760_p3, %p1759_p2 }
  0x2c   :  { %p1762_p5 = pnand %p1761_p4, %p1755_p1 }
  0x2e   :  { %1765 = shalt.err (!%p1762_p5)
}
  0x2f   :  { %53 = dma.hbm_to_vmem [thread:$0]  %s2358_s2, 1024, %s48_s24, [#allocation6], %s1841_s17, %s1841_s17, %s1842_s18  }
  0x30   :  { %s1774_s0 = scalar_lea.vmem %s72_s3, 1024  ;;  %p1779_p7 = scmp.lt.s32.totalorder %s72_s3, %s72_s3 }
  0x31   :  { %p1775_p6 = scmp.ne.s32.totalorder %s72_s3, %s1774_s0  ;;  %p1780_p8 = scmp.lt.s32.totalorder %s1774_s0, %s1774_s0 }
  0x33   :  { %p1781_p9 = por %p1780_p8, %p1779_p7 }
  0x35   :  { %p1782_p10 = pnand %p1781_p9, %p1775_p6 }
  0x37   :  { %1785 = shalt.err (!%p1782_p10)
}
  0x38   :  { %77 = dma.hbm_to_vmem [thread:$0]  %s2360_s4, 1024, %s72_s3, [#allocation9], %s1841_s17, %s1841_s17, %s1842_s18  }
  0x39   :  { %s1845_s11 = smov [#allocation11]  }
  0x3a   :  { %s83_s12 = sshll.u32 %s1845_s11, 4  ;;  %s84_s12 = int_to_ptr.vmem [resolvable:$true] %s83_s12 }
  0x3b   :  { %s1794_s13 = scalar_lea.vmem %s84_s12, 1024  ;;  %p1799_p12 = scmp.lt.s32.totalorder %s84_s12, %s84_s12 }
  0x3c   :  { %p1795_p11 = scmp.ne.s32.totalorder %s84_s12, %s1794_s13  ;;  %p1800_p13 = scmp.lt.s32.totalorder %s1794_s13, %s1794_s13 }
  0x3e   :  { %p1801_p0 = por %p1800_p13, %p1799_p12 }
  0x40   :  { %p1802_p1 = pnand %p1801_p0, %p1795_p11 }
  0x42   :  { %1805 = shalt.err (!%p1802_p1)
}
  0x43   :  { %89 = dma.hbm_to_vmem [thread:$0]  %s2361_s5, 1024, %s84_s12, [#allocation12], %s1841_s17, %s1841_s17, %s1842_s18  }
  0x44   :  { %1826 = dma.done.wait [#allocation3], 1024  }
  0x45   :  { %1827 = vsyncadd [#allocation3], 4294966272 }
  0x46   :  { %1828 = dma.done.wait [#allocation6], 2048  }
  0x47   :  { %1829 = vsyncadd [#allocation6], 4294965248 }
  0x48   :  { %1830 = dma.done.wait [#allocation9], 2048  }
  0x49   :  { %1831 = vsyncadd [#allocation9], 4294965248 }
  0x4a   :  { %1832 = dma.done.wait [#allocation12], 1024  }
  0x4b   :  { %1833 = vsyncadd [#allocation12], 4294966272  ;;  %v1614_v0 = vld [vmem:[#allocation7 + $0x38] sm:$0xff]   ;;  %v1616_v2 = vld [vmem:[#allocation7 + $0x30] sm:$0xff]   ;;  %s1846_s4 = smov 32  }
  0x4c   :  { %v1615_v1 = vld [vmem:[#allocation8 + $0x38] sm:$0xff]   ;;  %1506 = vmatprep.subr.bf16.mxu0 %v1614_v0  ;;  %v1617_v3 = vld [vmem:[#allocation8 + $0x30] sm:$0xff]   ;;  %v1618_v4 = vld [vmem:[#allocation7 + $0x28] sm:$0xff]  }
  0x4d   :  { %1530 = vmatprep.subr.bf16.mxu1 %v1615_v1  ;;  %1507 = vmatpush3.bf16.msra.mxu0 %v1614_v0  ;;  %v1619_v5 = vld [vmem:[#allocation8 + $0x28] sm:$0xff]   ;;  %v1620_v6 = vld [vmem:[#allocation7 + $0x20] sm:$0xff]   ;;  %v1622_v8 = vld [vmem:[#allocation7 + $0x18] sm:$0xff]  }
  0x4e   :  { %1531 = vmatpush3.bf16.msra.mxu1 %v1615_v1  ;;  %1508 = vmatprep.subr.bf16.mxu0 %v1616_v2  ;;  %v1621_v7 = vld [vmem:[#allocation8 + $0x20] sm:$0xff]   ;;  %v1623_v9 = vld [vmem:[#allocation8 + $0x18] sm:$0xff]   ;;  %v1624_v10 = vld [vmem:[#allocation7 + $0x10] sm:$0xff]  }
  0x4f   :  { %1532 = vmatprep.subr.bf16.mxu1 %v1617_v3  ;;  %v1929_v11 = vld [vmem:[#allocation2] sm:$0xff]  ;;  %v1931_v12 = vld [vmem:[#allocation2 + $0x8] sm:$0xff]  ;;  %v1625_v14 = vld [vmem:[#allocation8 + $0x10] sm:$0xff]  }
  0x50   :  { %2395 = vst [vmem:[#allocation19_spill] sm:$0xff] %v1929_v11  ;;  %2396 = vst [vmem:[#allocation20_spill] sm:$0xff] %v1931_v12  ;;  %v1933_v13 = vld [vmem:[#allocation5] sm:$0xff]  ;;  %v1935_v15 = vld [vmem:[#allocation5 + $0x8] sm:$0xff]  ;;  %v129_v16 = vpack.c.bf16 %v1931_v12, %v1929_v11 }
  0x51   :  { %1509 = vmatpush3.bf16.msra.mxu0 %v1616_v2  ;;  %2397 = vst [vmem:[#allocation21_spill] sm:$0xff] %v1933_v13  ;;  %2398 = vst [vmem:[#allocation22_spill] sm:$0xff] %v1935_v15  ;;  %v262_v17 = vpack.c.bf16 %v1935_v15, %v1933_v13  ;;  %v1626_v18 = vld [vmem:[#allocation7 + $0x8] sm:$0xff]   ;;  %v1628_v20 = vld [vmem:[#allocation7] sm:$0xff]  }
  0x52   :  { %1533 = vmatpush3.bf16.msra.mxu1 %v1617_v3  ;;  %1510 = vmatprep.subr.bf16.mxu0 %v1618_v4  ;;  %v1627_v19 = vld [vmem:[#allocation8 + $0x8] sm:$0xff]   ;;  %v1629_v21 = vld [vmem:[#allocation8] sm:$0xff]   ;;  %v1941_v22 = vld [vmem:[#allocation2 + $0x10] sm:$0xff] }
  0x53   :  { %1534 = vmatprep.subr.bf16.mxu1 %v1619_v5  ;;  %1522 = vmatprep.mubr.bf16.mxu0 %v129_v16  ;;  %2399 = vst [vmem:[#allocation23_spill] sm:$0xff] %v1941_v22  ;;  %v1943_v23 = vld [vmem:[#allocation2 + $0x18] sm:$0xff]  ;;  %v1945_v24 = vld [vmem:[#allocation5 + $0x10] sm:$0xff]  ;;  %v1949_v26 = vld [vmem:[#allocation2 + $0x20] sm:$0xff] }
  0x54   :  { %1546 = vmatprep.mubr.bf16.mxu1 %v262_v17  ;;  %2400 = vst [vmem:[#allocation24_spill] sm:$0xff] %v1943_v23  ;;  %2401 = vst [vmem:[#allocation25_spill] sm:$0xff] %v1945_v24  ;;  %v1947_v25 = vld [vmem:[#allocation5 + $0x18] sm:$0xff]  ;;  %v1951_v27 = vld [vmem:[#allocation2 + $0x28] sm:$0xff]  ;;  %v130_v30 = vpack.c.bf16 %v1943_v23, %v1941_v22 }
  0x55   :  { %1511 = vmatpush3.bf16.msra.mxu0 %v1618_v4  ;;  %2402 = vst [vmem:[#allocation26_spill] sm:$0xff] %v1947_v25  ;;  %2403 = vst [vmem:[#allocation27_spill] sm:$0xff] %v1949_v26  ;;  %v1953_v28 = vld [vmem:[#allocation5 + $0x20] sm:$0xff]  ;;  %v1955_v29 = vld [vmem:[#allocation5 + $0x28] sm:$0xff]  ;;  %v263_v31 = vpack.c.bf16 %v1947_v25, %v1945_v24  ;;  %v131_v32 = vpack.c.bf16 %v1951_v27, %v1949_v26 }
  0x56   :  { %1535 = vmatpush3.bf16.msra.mxu1 %v1619_v5  ;;  %1512 = vmatprep.subr.bf16.mxu0 %v1620_v6  ;;  %2404 = vst [vmem:[#allocation28_spill] sm:$0xff] %v1951_v27  ;;  %2405 = vst [vmem:[#allocation29_spill] sm:$0xff] %v1953_v28  ;;  %v264_v33 = vpack.c.bf16 %v1955_v29, %v1953_v28  ;;  %v1965_v34 = vld [vmem:[#allocation2 + $0x30] sm:$0xff]  ;;  %v1967_v35 = vld [vmem:[#allocation2 + $0x38] sm:$0xff] }
  0x57   :  { %1536 = vmatprep.subr.bf16.mxu1 %v1621_v7  ;;  %2406 = vst [vmem:[#allocation30_spill] sm:$0xff] %v1955_v29  ;;  %2407 = vst [vmem:[#allocation31_spill] sm:$0xff] %v1965_v34  ;;  %v1969_v36 = vld [vmem:[#allocation5 + $0x30] sm:$0xff]  ;;  %v1971_v37 = vld [vmem:[#allocation5 + $0x38] sm:$0xff]  ;;  %v132_v38 = vpack.c.bf16 %v1967_v35, %v1965_v34 }
  0x58   :  { %2408 = vst [vmem:[#allocation32_spill] sm:$0xff] %v1967_v35  ;;  %2409 = vst [vmem:[#allocation33_spill] sm:$0xff] %v1969_v36  ;;  %v265_v39 = vpack.c.bf16 %v1971_v37, %v1969_v36 }
  0x59   :  { %1513 = vmatpush3.bf16.msra.mxu0 %v1620_v6  ;;  %2410 = vst [vmem:[#allocation34_spill] sm:$0xff] %v1971_v37 }
  0x5a   :  { %1537 = vmatpush3.bf16.msra.mxu1 %v1621_v7  ;;  %1514 = vmatprep.subr.bf16.mxu0 %v1622_v8 }
  0x5b   :  { %1538 = vmatprep.subr.bf16.mxu1 %v1623_v9 }
  0x5d   :  { %1515 = vmatpush3.bf16.msra.mxu0 %v1622_v8 }
  0x5e   :  { %1539 = vmatpush3.bf16.msra.mxu1 %v1623_v9  ;;  %1516 = vmatprep.subr.bf16.mxu0 %v1624_v10 }
  0x5f   :  { %1540 = vmatprep.subr.bf16.mxu1 %v1625_v14 }
  0x61   :  { %1517 = vmatpush3.bf16.msra.mxu0 %v1624_v10 }
  0x62   :  { %1541 = vmatpush3.bf16.msra.mxu1 %v1625_v14  ;;  %1518 = vmatprep.subr.bf16.mxu0 %v1626_v18 }
  0x63   :  { %1542 = vmatprep.subr.bf16.mxu1 %v1627_v19 }
  0x65   :  { %1519 = vmatpush3.bf16.msra.mxu0 %v1626_v18 }
  0x66   :  { %1543 = vmatpush3.bf16.msra.mxu1 %v1627_v19  ;;  %1520 = vmatprep.subr.bf16.mxu0 %v1628_v20 }
  0x67   :  { %1544 = vmatprep.subr.bf16.mxu1 %v1629_v21 }
  0x69   :  { %1521 = vmatpush3.bf16.msra.mxu0 %v1628_v20 }
  0x6a   :  { %1545 = vmatpush3.bf16.msra.mxu1 %v1629_v21 }
  0x6c   :  { %1523 = vmatmul.mubr.bf16.vlgmr.msra.gmra.mxu0 %v130_v30 }
  0x6d   :  { %1547 = vmatmul.mubr.bf16.vlgmr.msra.gmra.mxu1 %v263_v31  ;;  %1526 = vmatprep.mubr.bf16.mxu0 %v131_v32 }
  0x6e   :  { %1550 = vmatprep.mubr.bf16.mxu1 %v264_v33 }
  0x74   :  { %1527 = vmatmul.mubr.bf16.gmra.mxu0 %v132_v38 }
  0x75   :  { %1551 = vmatmul.mubr.bf16.gmra.mxu1 %v265_v39 }
 0x12c   :  { %v1977_v40 = vpop.f32.mrf.mxu0 }
 0x12d   :  { %v427_v41 = vrot.slane %v1977_v40, 4  ;;  %v434_v42 = vmul.f32 %v1977_v40, %v1977_v40  ;;  %v1982_v43 = vpop.f32.mrf.mxu1 }
 0x12e   :  { %v570_v44 = vrot.slane %v1982_v43, 4  ;;  %v577_v45 = vmul.f32 %v1982_v43, %v1982_v43  ;;  %v1987_v46 = vpop.f32.mrf.mxu0 }
 0x12f   :  { %v428_v47 = vadd.f32 %v1977_v40, %v427_v41  ;;  %v435_v48 = vrot.slane %v434_v42, 4  ;;  %v397_v49 = vrot.slane %v1987_v46, 4  ;;  %v404_v50 = vmul.f32 %v1987_v46, %v1987_v46  ;;  %v1993_v51 = vpop.f32.mrf.mxu1 }
 0x130   :  { %v571_v52 = vadd.f32 %v1982_v43, %v570_v44  ;;  %v578_v53 = vrot.slane %v577_v45, 4  ;;  %v540_v54 = vrot.slane %v1993_v51, 4  ;;  %v547_v55 = vmul.f32 %v1993_v51, %v1993_v51  ;;  %v2001_v16 = vpop.f32.mrf.mxu0 }
 0x131   :  { %v429_v56 = vrot.slane %v428_v47, 2  ;;  %v436_v57 = vadd.f32 %v435_v48, %v434_v42  ;;  %v398_v58 = vadd.f32 %v397_v49, %v1987_v46  ;;  %v405_v59 = vrot.slane %v404_v50, 4  ;;  %2411 = vst [vmem:[#allocation35_spill] sm:$0xff] %v2001_v16  ;;  %v2003_v21 = vpop.f32.mrf.mxu1 }
 0x132   :  { %v572_v60 = vrot.slane %v571_v52, 2  ;;  %v579_v61 = vadd.f32 %v578_v53, %v577_v45  ;;  %v541_v62 = vadd.f32 %v540_v54, %v1993_v51  ;;  %v548_v63 = vrot.slane %v547_v55, 4  ;;  %v2014_v49 = vpop.f32.mrf.mxu0 }
 0x133   :  { %v430_v0 = vadd.f32 %v429_v56, %v428_v47  ;;  %v437_v1 = vrot.slane %v436_v57, 2  ;;  %v399_v2 = vrot.slane %v398_v58, 2  ;;  %v406_v3 = vadd.f32 %v405_v59, %v404_v50 }
 0x134   :  { %v573_v4 = vadd.f32 %v572_v60, %v571_v52  ;;  %v580_v5 = vrot.slane %v579_v61, 2  ;;  %v542_v6 = vrot.slane %v541_v62, 2  ;;  %v549_v7 = vadd.f32 %v548_v63, %v547_v55  ;;  %v2022_v55 = vpop.f32.mrf.mxu1 }
 0x135   :  { %v431_v8 = vrot.slane %v430_v0, 1  ;;  %v438_v9 = vadd.f32 %v437_v1, %v436_v57  ;;  %v400_v10 = vadd.f32 %v399_v2, %v398_v58  ;;  %v407_v14 = vrot.slane %v406_v3, 2 }
 0x136   :  { %v574_v17 = vrot.slane %v573_v4, 1  ;;  %v581_v18 = vadd.f32 %v580_v5, %v579_v61  ;;  %v543_v19 = vadd.f32 %v542_v6, %v541_v62  ;;  %v550_v20 = vrot.slane %v549_v7, 2 }
 0x137   :  { %v2005_v30 = vadd.f32 %v431_v8, %v430_v0  ;;  %v439_v31 = vrot.slane %v438_v9, 1  ;;  %v401_v32 = vrot.slane %v400_v10, 1  ;;  %v408_v33 = vadd.f32 %v407_v14, %v406_v3 }
 0x138   :  { %v2007_v38 = vadd.f32 %v574_v17, %v573_v4  ;;  %v582_v39 = vrot.slane %v581_v18, 1  ;;  %v544_v41 = vrot.slane %v543_v19, 1  ;;  %v551_v42 = vadd.f32 %v550_v20, %v549_v7 }
 0x139   :  { %v2009_v44 = vadd.f32 %v439_v31, %v438_v9  ;;  %v2011_v45 = vadd.f32 %v401_v32, %v400_v10  ;;  %v409_v47 = vrot.slane %v408_v33, 1  ;;  %v442_v48 = vrot.slane %v2001_v16, 4 }
 0x13a   :  { %v2016_v50 = vadd.f32 %v582_v39, %v581_v18  ;;  %v2018_v52 = vadd.f32 %v544_v41, %v543_v19  ;;  %v552_v53 = vrot.slane %v551_v42, 1  ;;  %v449_v54 = vmul.f32 %v2001_v16, %v2001_v16  ;;  %v2041_v41 = vpop.f32.mrf.mxu0 }
 0x13b   :  { %v2024_v56 = vadd.f32 %v409_v47, %v408_v33  ;;  %v443_v57 = vadd.f32 %v2001_v16, %v442_v48  ;;  %v585_v58 = vrot.slane %v2003_v21, 4  ;;  %v592_v59 = vmul.f32 %v2003_v21, %v2003_v21  ;;  %2412 = vst [vmem:[#allocation36_spill] sm:$0xff] %v2041_v41 }
 0x13c   :  { %v2030_v60 = vadd.f32 %v552_v53, %v551_v42  ;;  %v450_v61 = vrot.slane %v449_v54, 4  ;;  %v412_v62 = vrot.slane %v2014_v49, 4  ;;  %v419_v63 = vmul.f32 %v2014_v49, %v2014_v49 }
 0x13d   :  { %v444_v0 = vrot.slane %v443_v57, 2  ;;  %v586_v1 = vadd.f32 %v2003_v21, %v585_v58  ;;  %v593_v2 = vrot.slane %v592_v59, 4  ;;  %v555_v3 = vrot.slane %v2022_v55, 4 }
 0x13e   :  { %v451_v4 = vadd.f32 %v450_v61, %v449_v54  ;;  %v413_v5 = vadd.f32 %v412_v62, %v2014_v49  ;;  %v420_v6 = vrot.slane %v419_v63, 4  ;;  %v562_v7 = vmul.f32 %v2022_v55, %v2022_v55  ;;  %v2045_v54 = vpop.f32.mrf.mxu1 }
 0x13f   :  { %v445_v8 = vadd.f32 %v444_v0, %v443_v57  ;;  %v587_v9 = vrot.slane %v586_v1, 2  ;;  %v594_v10 = vadd.f32 %v593_v2, %v592_v59  ;;  %v556_v14 = vadd.f32 %v555_v3, %v2022_v55 }
 0x140   :  { %v452_v17 = vrot.slane %v451_v4, 2  ;;  %v414_v18 = vrot.slane %v413_v5, 2  ;;  %v421_v19 = vadd.f32 %v420_v6, %v419_v63  ;;  %v563_v20 = vrot.slane %v562_v7, 4  ;;  %v2056_v6 = vpop.f32.mrf.mxu0 }
 0x141   :  { %v446_v31 = vrot.slane %v445_v8, 1  ;;  %v588_v32 = vadd.f32 %v587_v9, %v586_v1  ;;  %v595_v33 = vrot.slane %v594_v10, 2  ;;  %v557_v39 = vrot.slane %v556_v14, 2  ;;  %2413 = vst [vmem:[#allocation37_spill] sm:$0xff] %v2056_v6 }
 0x142   :  { %v2043_v42 = vadd.f32 %v452_v17, %v451_v4  ;;  %v415_v47 = vadd.f32 %v414_v18, %v413_v5  ;;  %v422_v48 = vrot.slane %v421_v19, 2  ;;  %v564_v53 = vadd.f32 %v563_v20, %v562_v7 }
 0x143   :  { %v2047_v57 = vadd.f32 %v446_v31, %v445_v8  ;;  %v589_v58 = vrot.slane %v588_v32, 1  ;;  %v2049_v59 = vadd.f32 %v595_v33, %v594_v10  ;;  %v558_v61 = vadd.f32 %v557_v39, %v556_v14  ;;  %v2060_v14 = vpop.f32.mrf.mxu1 }
 0x144   :  { %v416_v63 = vrot.slane %v415_v47, 1  ;;  %v423_v0 = vadd.f32 %v422_v48, %v421_v19  ;;  %v565_v1 = vrot.slane %v564_v53, 2  ;;  %v487_v5 = vrot.slane %v2041_v41, 4 }
 0x145   :  { %v2052_v2 = vadd.f32 %v589_v58, %v588_v32  ;;  %v559_v4 = vrot.slane %v558_v61, 1  ;;  %v494_v10 = vmul.f32 %v2041_v41, %v2041_v41  ;;  %v630_v19 = vrot.slane %v2045_v54, 4 }
 0x146   :  { %v417_v7 = vadd.f32 %v416_v63, %v415_v47  ;;  %v424_v8 = vrot.slane %v423_v0, 1  ;;  %v566_v9 = vadd.f32 %v565_v1, %v564_v53  ;;  %v488_v18 = vadd.f32 %v2041_v41, %v487_v5 }
 0x147   :  { %v560_v17 = vadd.f32 %v559_v4, %v558_v61  ;;  %v637_v20 = vmul.f32 %v2045_v54, %v2045_v54  ;;  %v495_v39 = vrot.slane %v494_v10, 4  ;;  %v2071_v53 = vadd.f32 %v2045_v54, %v630_v19  ;;  %v2073_v61 = vpop.f32.mrf.mxu0 }
 0x148   :  { %v418_v31 = vadd.f32 %v417_v7, %v2011_v45  ;;  %v425_v32 = vadd.f32 %v424_v8, %v423_v0  ;;  %v567_v33 = vrot.slane %v566_v9, 1  ;;  %v489_v48 = vrot.slane %v488_v18, 2  ;;  %2414 = vst [vmem:[#allocation38_spill] sm:$0xff] %v2073_v61  ;;  %v2082_v0 = vpop.f32.mrf.mxu1 }
 0x149   :  { %v2068_v47 = vadd.f32 %v560_v17, %v2018_v52  ;;  %v638_v58 = vrot.slane %v637_v20, 4  ;;  %v2077_v1 = vadd.f32 %v495_v39, %v494_v10  ;;  %v457_v4 = vrot.slane %v2056_v6, 4  ;;  %2415 = vst [vmem:[#allocation39_spill] sm:$0xff] %v2082_v0 }
 0x14a   :  { %v2075_v63 = vadd.f32 %v567_v33, %v566_v9  ;;  %v464_v45 = vmul.f32 %v2056_v6, %v2056_v6  ;;  %v600_v7 = vrot.slane %v2060_v14, 4  ;;  %v607_v8 = vmul.f32 %v2060_v14, %v2060_v14  ;;  %v2103_v37 = vpop.f32.mrf.mxu1 }
 0x14b   :  { %v2085_v5 = vadd.f32 %v638_v58, %v637_v20  ;;  %v458_v9 = vadd.f32 %v457_v4, %v2056_v6  ;;  %v502_v17 = vrot.slane %v2073_v61, 4  ;;  %v509_v19 = vmul.f32 %v2073_v61, %v2073_v61  ;;  %v2100_v58 = vpop.f32.mrf.mxu0 }
 0x14c   :  { %v465_v10 = vrot.slane %v464_v45, 4  ;;  %v601_v33 = vadd.f32 %v600_v7, %v2060_v14  ;;  %v608_v39 = vrot.slane %v607_v8, 4  ;;  %v645_v3 = vrot.slane %v2082_v0, 4  ;;  %2416 = vst [vmem:[#allocation40_spill] sm:$0xff] %v2100_v58 }
 0x14d   :  { %v2098_v20 = vmul.f32 %v2082_v0, %v2082_v0  ;;  %v459_v52 = vrot.slane %v458_v9, 2  ;;  %v503_v4 = vadd.f32 %v2073_v61, %v502_v17  ;;  %v510_v35 = vrot.slane %v509_v19, 4 }
 0x14e   :  { %v466_v62 = vadd.f32 %v465_v10, %v464_v45  ;;  %v602_v34 = vrot.slane %v601_v33, 2  ;;  %v609_v36 = vadd.f32 %v608_v39, %v607_v8  ;;  %v2106_v7 = vadd.f32 %v2082_v0, %v645_v3 }
 0x14f   :  { %v460_v29 = vadd.f32 %v459_v52, %v458_v9  ;;  %v472_v28 = vrot.slane %v2100_v58, 4  ;;  %v479_v23 = vmul.f32 %v2100_v58, %v2100_v58  ;;  %v615_v17 = vrot.slane %v2103_v37, 4 }
 0x150   :  { %v467_v26 = vrot.slane %v466_v62, 2  ;;  %v603_v45 = vadd.f32 %v602_v34, %v601_v33  ;;  %v610_v10 = vrot.slane %v609_v36, 2  ;;  %v622_v25 = vmul.f32 %v2103_v37, %v2103_v37 }
 0x151   :  { %v461_v8 = vrot.slane %v460_v29, 1  ;;  %v473_v3 = vadd.f32 %v472_v28, %v2100_v58  ;;  %v480_v22 = vrot.slane %v479_v23, 4  ;;  %v616_v9 = vadd.f32 %v615_v17, %v2103_v37 }
 0x152   :  { %v468_v39 = vadd.f32 %v467_v26, %v466_v62  ;;  %v604_v27 = vrot.slane %v603_v45, 1  ;;  %v2116_v52 = vadd.f32 %v610_v10, %v609_v36  ;;  %v623_v24 = vrot.slane %v622_v25, 4 }
 0x153   :  { %v474_v12 = vrot.slane %v473_v3, 2  ;;  %v481_v15 = vadd.f32 %v480_v22, %v479_v23  ;;  %v433_v34 = vadd.f32 %v2005_v30, %v418_v31  ;;  %v462_v33 = vadd.f32 %v461_v8, %v460_v29 }
 0x154   :  { %v617_v11 = vrot.slane %v616_v9, 2  ;;  %v624_v13 = vadd.f32 %v623_v24, %v622_v25  ;;  %v490_v0 = vadd.f32 %v489_v48, %v488_v18  ;;  %v504_v61 = vrot.slane %v503_v4, 2 }
 0x155   :  { %v475_v41 = vadd.f32 %v474_v12, %v473_v3  ;;  %v482_v26 = vrot.slane %v481_v15, 2  ;;  %v448_v28 = vadd.f32 %v2047_v57, %v433_v34  ;;  %v426_v62 = vadd.f32 %v425_v32, %v2024_v56 }
 0x156   :  { %v618_v36 = vadd.f32 %v617_v11, %v616_v9  ;;  %v625_v10 = vrot.slane %v624_v13, 2  ;;  %v491_v58 = vrot.slane %v490_v0, 1  ;;  %v505_v17 = vadd.f32 %v504_v61, %v503_v4 }
 0x157   :  { %v463_v6 = vadd.f32 %v462_v33, %v448_v28  ;;  %v476_v16 = vrot.slane %v475_v41, 1  ;;  %v441_v22 = vadd.f32 %v2009_v44, %v426_v62  ;;  %v2417_v23 = vrot.slane %v2043_v42, 1 }
 0x158   :  { %v492_v25 = vadd.f32 %v491_v58, %v490_v0  ;;  %v506_v29 = vrot.slane %v505_v17, 1  ;;  %v469_v12 = vrot.slane %v468_v39, 1  ;;  %v483_v30 = vadd.f32 %v482_v26, %v481_v15 }
 0x159   :  { %v455_v24 = vadd.f32 %v2417_v23, %v2043_v42  ;;  %v477_v18 = vadd.f32 %v476_v16, %v475_v41  ;;  %v497_v56 = vrot.slane %v2077_v1, 2  ;;  %v511_v11 = vadd.f32 %v510_v35, %v509_v19 }
 0x15a   :  { %v507_v31 = vadd.f32 %v506_v29, %v505_v17  ;;  %v470_v32 = vadd.f32 %v469_v12, %v468_v39  ;;  %v484_v48 = vrot.slane %v483_v30, 1  ;;  %v576_v61 = vadd.f32 %v2007_v38, %v2068_v47 }
 0x15b   :  { %v456_v57 = vadd.f32 %v455_v24, %v441_v22  ;;  %v478_v44 = vadd.f32 %v477_v18, %v463_v6  ;;  %v498_v4 = vadd.f32 %v497_v56, %v2077_v1  ;;  %v512_v8 = vrot.slane %v511_v11, 2 }
 0x15c   :  { %v605_v42 = vadd.f32 %v604_v27, %v603_v45  ;;  %v485_v58 = vadd.f32 %v484_v48, %v483_v30  ;;  %v591_v15 = vadd.f32 %v2052_v2, %v576_v61  ;;  %v619_v16 = vrot.slane %v618_v36, 1 }
 0x15d   :  { %v471_v0 = vadd.f32 %v470_v32, %v456_v57  ;;  %v493_v41 = vadd.f32 %v492_v25, %v478_v44  ;;  %v499_v3 = vrot.slane %v498_v4, 1  ;;  %v513_v9 = vadd.f32 %v512_v8, %v511_v11 }
 0x15e   :  { %v2418_v35 = vrot.slane %v2071_v53, 2  ;;  %v606_v34 = vadd.f32 %v605_v42, %v591_v15  ;;  %v620_v38 = vadd.f32 %v619_v16, %v618_v36  ;;  %v647_v6 = vrot.slane %v2106_v7, 2 }
 0x15f   :  { %v486_v39 = vadd.f32 %v485_v58, %v471_v0  ;;  %v508_v47 = vadd.f32 %v507_v31, %v493_v41  ;;  %v500_v1 = vadd.f32 %v499_v3, %v498_v4  ;;  %v514_v27 = vrot.slane %v513_v9, 1  ;;  %v1630_v3 = vld [vmem:[#allocation10 + $0x38] sm:$0xff]  }
 0x160   :  { %v633_v19 = vadd.f32 %v2418_v35, %v2071_v53  ;;  %v621_v33 = vadd.f32 %v620_v38, %v606_v34  ;;  %v648_v2 = vadd.f32 %v647_v6, %v2106_v7  ;;  %v569_v26 = vadd.f32 %v2075_v63, %v2030_v60  ;;  %1554 = vmatprep.subr.bf16.mxu0 %v1630_v3  ;;  %v1632_v35 = vld [vmem:[#allocation10 + $0x28] sm:$0xff]   ;;  %v1635_v34 = vld [vmem:[#allocation10 + $0x10] sm:$0xff]   ;;  %v1637_v6 = vld [vmem:[#allocation10] sm:$0xff]  }
 0x161   :  { %v2419_v28 = vrot.slane %v2049_v59, 1  ;;  %517 = vrot.lane.b32.xlu0 %v508_v47, %s1841_s17  ;;  %v501_v53 = vadd.f32 %v500_v1, %v486_v39  ;;  %v515_v36 = vadd.f32 %v514_v27, %v513_v9  ;;  %v612_v22 = vrot.slane %v2116_v52, 1  ;;  %v1631_v9 = vld [vmem:[#allocation10 + $0x30] sm:$0xff]   ;;  %1555 = vmatpush3.bf16.msra.mxu0 %v1630_v3  ;;  %v1634_v39 = vld [vmem:[#allocation10 + $0x18] sm:$0xff]   ;;  %v1636_v38 = vld [vmem:[#allocation10 + $0x8] sm:$0xff]  }
 0x162   :  { %v634_v45 = vrot.slane %v633_v19, 1  ;;  %v649_v23 = vrot.slane %v648_v2, 1  ;;  %v584_v24 = vadd.f32 %v2016_v50, %v569_v26  ;;  %v626_v25 = vadd.f32 %v625_v10, %v624_v13  ;;  %1556 = vmatprep.subr.bf16.mxu0 %v1631_v9  ;;  %v2422_v3 = vld [vmem:[#allocation37_spill] sm:$0xff] }
 0x163   :  { %v598_v62 = vadd.f32 %v2419_v28, %v2049_v59  ;;  %v640_v7 = vrot.slane %v2085_v5, 2  ;;  %v516_v29 = vadd.f32 %v515_v36, %v501_v53  ;;  %v613_v60 = vadd.f32 %v612_v22, %v2116_v52 }
 0x164   :  { %v635_v17 = vadd.f32 %v634_v45, %v633_v19  ;;  %v2420_v59 = vrot.slane %v2098_v20, 4  ;;  %v650_v30 = vadd.f32 %v649_v23, %v648_v2  ;;  %v627_v57 = vrot.slane %v626_v25, 1  ;;  %v1633_v19 = vld [vmem:[#allocation10 + $0x20] sm:$0xff]  }
 0x165   :  { %v599_v18 = vadd.f32 %v598_v62, %v584_v24  ;;  %v641_v56 = vadd.f32 %v640_v7, %v2085_v5  ;;  %523 = vrot.lane.b32.xlu1 %v516_v29, %s1841_s17  ;;  %1557 = vmatpush3.bf16.msra.mxu0 %v1631_v9  ;;  %v2423_v9 = vld [vmem:[#allocation40_spill] sm:$0xff] }
 0x166   :  { %v636_v12 = vadd.f32 %v635_v17, %v621_v33  ;;  %v654_v63 = vadd.f32 %v2420_v59, %v2098_v20  ;;  %v628_v10 = vadd.f32 %v627_v57, %v626_v25  ;;  %1558 = vmatprep.subr.bf16.mxu0 %v1632_v35  ;;  %v538_v57 = vld [vmem:[%s2362_s6 + $0x1] sm:$0x1] }
 0x167   :  { %v614_v13 = vadd.f32 %v613_v60, %v599_v18  ;;  %v642_v31 = vrot.slane %v641_v56, 1 }
 0x168   :  { %v655_v11 = vrot.slane %v654_v63, 2  ;;  %v651_v50 = vadd.f32 %v650_v30, %v636_v12  ;;  %v681_v12 = vlaneseq }
 0x169   :  { %v629_v52 = vadd.f32 %v628_v10, %v614_v13  ;;  %v643_v48 = vadd.f32 %v642_v31, %v641_v56  ;;  %1559 = vmatpush3.bf16.msra.mxu0 %v1632_v35  ;;  %v396_v13 = vld [vmem:[%s2363_s7] sm:$0x1]  ;;  %v539_v31 = vld [vmem:[%s2363_s7 + $0x1] sm:$0x1] }
 0x16a   :  { %v656_v32 = vadd.f32 %v655_v11, %v654_v63  ;;  %660 = vrot.lane.b32.xlu0 %v651_v50, %s1841_s17  ;;  %1560 = vmatprep.subr.bf16.mxu0 %v1633_v19  ;;  %v682_v60 = vshrl.u32 %v681_v12, 7  ;;  %v395_v63 = vld [vmem:[%s2362_s6] sm:$0x1] }
 0x16b   :  { %v644_v44 = vadd.f32 %v643_v48, %v629_v52 }
 0x16c   :  { %v657_v61 = vrot.slane %v656_v32, 1  ;;  %v2160_v30 = vsub.s32 0, %v682_v60 }
 0x16d   :  { %1561 = vmatpush3.bf16.msra.mxu0 %v1633_v19  ;;  %v2424_v19 = vld [vmem:[#allocation36_spill] sm:$0xff] }
 0x16e   :  { %v658_v20 = vadd.f32 %v657_v61, %v656_v32  ;;  %1562 = vmatprep.subr.bf16.mxu0 %v1634_v39 }
 0x170   :  { %v659_v4 = vadd.f32 %v658_v20, %v644_v44 }
 0x171   :  { %1563 = vmatpush3.bf16.msra.mxu0 %v1634_v39  ;;  %v2425_v39 = vld [vmem:[#allocation38_spill] sm:$0xff] }
 0x172   :  { %666 = vrot.lane.b32.xlu1 %v659_v4, %s1841_s17  ;;  %1564 = vmatprep.subr.bf16.mxu0 %v1635_v34 }
 0x175   :  { %1565 = vmatpush3.bf16.msra.mxu0 %v1635_v34  ;;  %v2426_v34 = vld [vmem:[#allocation39_spill] sm:$0xff] }
 0x176   :  { %1566 = vmatprep.subr.bf16.mxu0 %v1636_v38 }
 0x179   :  { %1567 = vmatpush3.bf16.msra.mxu0 %v1636_v38 }
 0x17a   :  { %1568 = vmatprep.subr.bf16.mxu0 %v1637_v6 }
 0x17d   :  { %1569 = vmatpush3.bf16.msra.mxu0 %v1637_v6 }
 0x1d3   :  { %v518_v8 = vpop.permute.xlu0 %517 }
 0x1d4   :  { %v519_v5 = vadd.f32 %v518_v8, %v508_v47 }
 0x1d6   :  { %520 = vrot.lane.b32.xlu0 %v519_v5, %s1846_s4 }
 0x1d7   :  { %v524_v42 = vpop.permute.xlu1 %523 }
 0x1d8   :  { %v525_v0 = vadd.f32 %v524_v42, %v516_v29 }
 0x1da   :  { %526 = vrot.lane.b32.xlu0 %v525_v0, %s1846_s4 }
 0x1dc   :  { %v661_v58 = vpop.permute.xlu0 %660 }
 0x1dd   :  { %v662_v15 = vadd.f32 %v661_v58, %v651_v50 }
 0x1df   :  { %663 = vrot.lane.b32.xlu1 %v662_v15, %s1846_s4 }
 0x1e4   :  { %v667_v16 = vpop.permute.xlu1 %666 }
 0x1e5   :  { %v668_v41 = vadd.f32 %v667_v16, %v659_v4 }
 0x1e7   :  { %669 = vrot.lane.b32.xlu1 %v668_v41, %s1846_s4 }
 0x248   :  { %v521_v47 = vpop.permute.xlu0 %520 }
 0x249   :  { %v522_v1 = vadd.f32 %v521_v47, %v519_v5 }
 0x24b   :  { %v529_v27 = vmul.f32 0.00390625, %v522_v1 }
 0x24c   :  { %v527_v45 = vpop.permute.xlu0 %526 }
 0x24d   :  { %v528_v33 = vadd.f32 %v527_v45, %v525_v0  ;;  %v531_v2 = vmul.f32 %v529_v27, %v529_v27 }
 0x24f   :  { %v530_v28 = vmul.f32 0.00390625, %v528_v33 }
 0x251   :  { %v664_v26 = vpop.permute.xlu1 %663  ;;  %v532_v53 = vsub.f32 %v530_v28, %v531_v2 }
 0x252   :  { %v665_v62 = vadd.f32 %v664_v26, %v662_v15 }
 0x253   :  { %v533_v36 = vadd.f32 1e-05, %v532_v53 }
 0x254   :  { %v672_v17 = vmul.f32 0.00390625, %v665_v62 }
 0x255   :  { %1646 = vrsqrt.f32 %v533_v36 }
 0x256   :  { %v674_v24 = vmul.f32 %v672_v17, %v672_v17 }
 0x259   :  { %v670_v22 = vpop.permute.xlu1 %669 }
 0x25a   :  { %v671_v23 = vadd.f32 %v670_v22, %v668_v41  ;;  %v2421_v41 = vld [vmem:[#allocation35_spill] sm:$0xff] }
 0x25c   :  { %v673_v25 = vmul.f32 0.00390625, %v671_v23 }
 0x25e   :  { %v675_v7 = vsub.f32 %v673_v25, %v674_v24 }
 0x260   :  { %v676_v29 = vadd.f32 1e-05, %v675_v7 }
 0x262   :  { %1648 = vrsqrt.f32 %v676_v29  ;;  %v1647_v59 = vpop.eup %1646 }
 0x263   :  { %v535_v18 = vmul.f32 %v1647_v59, %v395_v63 }
 0x265   :  { %v536_v11 = vmul.f32 %v535_v18, %v529_v27  ;;  %v684_v50 = vrot.slane %v535_v18, %v2160_v30 }
 0x267   :  { %v537_v48 = vsub.f32 %v396_v13, %v536_v11  ;;  %v685_v61 = vmul.f32 %v684_v50, %v1987_v46  ;;  %v686_v44 = vmul.f32 %v684_v50, %v2014_v49  ;;  %v687_v20 = vmul.f32 %v1977_v40, %v684_v50 }
 0x268   :  { %v688_v49 = vmul.f32 %v2421_v41, %v684_v50  ;;  %v689_v40 = vmul.f32 %v684_v50, %v2422_v3  ;;  %v690_v35 = vmul.f32 %v684_v50, %v2423_v9  ;;  %v2430_v3 = vld [vmem:[#allocation20_spill] sm:$0xff]  ;;  %v2431_v9 = vld [vmem:[#allocation25_spill] sm:$0xff] }
 0x26f   :  { %v1649_v56 = vpop.eup %1648 }
 0x270   :  { %v678_v10 = vmul.f32 %v1649_v56, %v538_v57 }
 0x272   :  { %v679_v32 = vmul.f32 %v678_v10, %v672_v17  ;;  %v696_v52 = vrot.slane %v678_v10, %v2160_v30 }
 0x274   :  { %v680_v4 = vsub.f32 %v539_v31, %v679_v32  ;;  %v697_v8 = vmul.f32 %v696_v52, %v1993_v51  ;;  %v698_v5 = vmul.f32 %v696_v52, %v2022_v55  ;;  %v699_v42 = vmul.f32 %v1982_v43, %v696_v52 }
 0x275   :  { %v700_v0 = vmul.f32 %v2003_v21, %v696_v52  ;;  %v701_v58 = vmul.f32 %v696_v52, %v2060_v14  ;;  %v702_v15 = vmul.f32 %v696_v52, %v2103_v37  ;;  %v703_v16 = vmul.f32 %v2045_v54, %v696_v52 }
 0x276   :  { %v713_v46 = vadd.f32 %v680_v4, %v537_v48  ;;  %v705_v51 = vadd.f32 %v697_v8, %v685_v61  ;;  %v691_v55 = vmul.f32 %v2424_v19, %v684_v50  ;;  %v692_v43 = vmul.f32 %v2425_v39, %v684_v50  ;;  %v2434_v39 = vld [vmem:[#allocation24_spill] sm:$0xff] }
 0x277   :  { %v704_v21 = vmul.f32 %v2426_v34, %v696_v52  ;;  %v706_v38 = vadd.f32 %v698_v5, %v686_v44  ;;  %v707_v37 = vadd.f32 %v699_v42, %v687_v20  ;;  %v708_v6 = vadd.f32 %v700_v0, %v688_v49  ;;  %v2429_v49 = vld [vmem:[#allocation22_spill] sm:$0xff] }
 0x278   :  { %v717_v14 = vrot.slane %v713_v46, %v2160_v30  ;;  %v709_v54 = vadd.f32 %v701_v58, %v689_v40  ;;  %v710_v47 = vadd.f32 %v702_v15, %v690_v35  ;;  %v711_v1 = vadd.f32 %v703_v16, %v691_v55  ;;  %v2427_v16 = vld [vmem:[#allocation21_spill] sm:$0xff]  ;;  %v2428_v46 = vld [vmem:[#allocation19_spill] sm:$0xff]  ;;  %v2433_v55 = vld [vmem:[#allocation26_spill] sm:$0xff] }
 0x279   :  { %v712_v27 = vadd.f32 %v704_v21, %v692_v43  ;;  %v766_v41 = vsub.f32 %v2428_v46, %v2427_v16  ;;  %v767_v40 = vsub.f32 %v2430_v3, %v2429_v49  ;;  %v2432_v35 = vld [vmem:[#allocation23_spill] sm:$0xff]  ;;  %v769_v43 = vsub.f32 %v2434_v39, %v2433_v55  ;;  %v2435_v21 = vld [vmem:[#allocation29_spill] sm:$0xff] }
 0x27a   :  { %v718_v45 = vadd.f32 %v717_v14, %v705_v51  ;;  %v719_v33 = vadd.f32 %v717_v14, %v706_v38  ;;  %v720_v2 = vadd.f32 %v717_v14, %v707_v37  ;;  %v721_v26 = vadd.f32 %v717_v14, %v708_v6 }
 0x27b   :  { %v722_v28 = vadd.f32 %v717_v14, %v709_v54  ;;  %v723_v62 = vadd.f32 %v717_v14, %v710_v47  ;;  %v724_v53 = vadd.f32 %v717_v14, %v711_v1  ;;  %v725_v36 = vadd.f32 %v717_v14, %v712_v27  ;;  %v2436_v14 = vld [vmem:[#allocation27_spill] sm:$0xff]  ;;  %v2437_v54 = vld [vmem:[#allocation30_spill] sm:$0xff]  ;;  %v2438_v47 = vld [vmem:[#allocation28_spill] sm:$0xff] }
 0x27c   :  { %v726_v17 = vsub.f32 0.0, %v718_v45  ;;  %v727_v22 = vsub.f32 0.0, %v719_v33  ;;  %v728_v23 = vsub.f32 0.0, %v720_v2  ;;  %v729_v24 = vsub.f32 0.0, %v721_v26  ;;  %v2439_v33 = vld [vmem:[#allocation33_spill] sm:$0xff]  ;;  %v2440_v2 = vld [vmem:[#allocation31_spill] sm:$0xff] }
 0x27d   :  { %v730_v25 = vsub.f32 0.0, %v722_v28  ;;  %v731_v7 = vsub.f32 0.0, %v723_v62  ;;  %v732_v29 = vsub.f32 0.0, %v724_v53  ;;  %v733_v18 = vsub.f32 0.0, %v725_v36  ;;  %v2441_v36 = vld [vmem:[#allocation34_spill] sm:$0xff] }
 0x27e   :  { %v734_v12 = vmul.f32 1.442695, %v726_v17  ;;  %v736_v60 = vmul.f32 1.442695, %v727_v22  ;;  %v738_v59 = vmul.f32 1.442695, %v728_v23  ;;  %v768_v51 = vsub.f32 %v2432_v35, %v2431_v9 }
 0x27f   :  { %v740_v63 = vmul.f32 1.442695, %v729_v24  ;;  %v742_v57 = vmul.f32 1.442695, %v730_v25  ;;  %v744_v56 = vmul.f32 1.442695, %v731_v7  ;;  %v770_v38 = vsub.f32 %v2436_v14, %v2435_v21 }
 0x280   :  { %1650 = vpow2.f32 %v734_v12  ;;  %v746_v11 = vmul.f32 1.442695, %v732_v29  ;;  %v748_v50 = vmul.f32 1.442695, %v733_v18  ;;  %v771_v1 = vsub.f32 %v2438_v47, %v2437_v54  ;;  %v2442_v17 = vld [vmem:[#allocation32_spill] sm:$0xff] }
 0x281   :  { %1652 = vpow2.f32 %v736_v60  ;;  %v772_v26 = vsub.f32 %v2440_v2, %v2439_v33  ;;  %v773_v22 = vsub.f32 %v2442_v17, %v2441_v36 }
 0x282   :  { %1654 = vpow2.f32 %v738_v59 }
 0x283   :  { %1656 = vpow2.f32 %v740_v63 }
 0x284   :  { %1658 = vpow2.f32 %v742_v57 }
 0x285   :  { %1660 = vpow2.f32 %v744_v56 }
 0x286   :  { %1662 = vpow2.f32 %v746_v11 }
 0x287   :  { %1664 = vpow2.f32 %v748_v50 }
 0x28d   :  { %v1651_v13 = vpop.eup %1650 }
 0x28e   :  { %v1653_v10 = vpop.eup %1652  ;;  %v750_v31 = vadd.f32 1.0, %v1651_v13 }
 0x28f   :  { %v1655_v32 = vpop.eup %1654  ;;  %v751_v52 = vadd.f32 1.0, %v1653_v10 }
 0x290   :  { %v1657_v48 = vpop.eup %1656  ;;  %1666 = vrcp.f32 %v750_v31  ;;  %v752_v61 = vadd.f32 1.0, %v1655_v32 }
 0x291   :  { %v1659_v44 = vpop.eup %1658  ;;  %1668 = vrcp.f32 %v751_v52  ;;  %v753_v20 = vadd.f32 1.0, %v1657_v48 }
 0x292   :  { %v1661_v4 = vpop.eup %1660  ;;  %1670 = vrcp.f32 %v752_v61  ;;  %v754_v8 = vadd.f32 1.0, %v1659_v44 }
 0x293   :  { %v1663_v5 = vpop.eup %1662  ;;  %1672 = vrcp.f32 %v753_v20  ;;  %v755_v42 = vadd.f32 1.0, %v1661_v4 }
 0x294   :  { %v1665_v0 = vpop.eup %1664  ;;  %1674 = vrcp.f32 %v754_v8  ;;  %v756_v58 = vadd.f32 1.0, %v1663_v5 }
 0x295   :  { %1676 = vrcp.f32 %v755_v42  ;;  %v757_v15 = vadd.f32 1.0, %v1665_v0 }
 0x296   :  { %1678 = vrcp.f32 %v756_v58 }
 0x297   :  { %1680 = vrcp.f32 %v757_v15 }
 0x29d   :  { %v1667_v19 = vpop.eup %1666 }
 0x29e   :  { %v1669_v34 = vpop.eup %1668  ;;  %v774_v37 = vmul.f32 %v1667_v19, %v766_v41 }
 0x29f   :  { %v1671_v6 = vpop.eup %1670  ;;  %v775_v27 = vmul.f32 %v1669_v34, %v767_v40 }
 0x2a0   :  { %v1673_v45 = vpop.eup %1672  ;;  %v782_v28 = vadd.f32 %v774_v37, %v2427_v16  ;;  %v776_v62 = vmul.f32 %v1671_v6, %v768_v51 }
 0x2a1   :  { %v1675_v53 = vpop.eup %1674  ;;  %v783_v23 = vadd.f32 %v775_v27, %v2429_v49  ;;  %v777_v24 = vmul.f32 %v1673_v45, %v769_v43 }
 0x2a2   :  { %v1677_v25 = vpop.eup %1676  ;;  %v784_v7 = vadd.f32 %v776_v62, %v2431_v9  ;;  %v778_v29 = vmul.f32 %v1675_v53, %v770_v38 }
 0x2a3   :  { %v1679_v12 = vpop.eup %1678  ;;  %v790_v60 = vpack.c.bf16 %v783_v23, %v782_v28  ;;  %v785_v59 = vadd.f32 %v777_v24, %v2433_v55  ;;  %v779_v63 = vmul.f32 %v1677_v25, %v771_v1 }
 0x2a4   :  { %v1681_v18 = vpop.eup %1680  ;;  %v786_v57 = vadd.f32 %v778_v29, %v2435_v21  ;;  %v780_v56 = vmul.f32 %v1679_v12, %v772_v26 }
 0x2a5   :  { %1570 = vmatprep.mubr.bf16.mxu0 %v790_v60  ;;  %v791_v11 = vpack.c.bf16 %v785_v59, %v784_v7  ;;  %v787_v50 = vadd.f32 %v779_v63, %v2437_v54  ;;  %v781_v13 = vmul.f32 %v1681_v18, %v773_v22 }
 0x2a6   :  { %v788_v10 = vadd.f32 %v780_v56, %v2439_v33 }
 0x2a7   :  { %1571 = vmatmul.mubr.bf16.vlgmr.msra.gmra.mxu0 %v791_v11  ;;  %v792_v31 = vpack.c.bf16 %v787_v50, %v786_v57  ;;  %v789_v32 = vadd.f32 %v781_v13, %v2441_v36 }
 0x2a9   :  { %1574 = vmatprep.mubr.bf16.mxu0 %v792_v31  ;;  %v793_v52 = vpack.c.bf16 %v789_v32, %v788_v10 }
 0x2af   :  { %1575 = vmatmul.mubr.bf16.gmra.mxu0 %v793_v52 }
 0x367   :  { %v2214_v48 = vpop.f32.mrf.mxu0 }
 0x368   :  { %v955_v61 = vrot.slane %v2214_v48, 4  ;;  %v962_v44 = vmul.f32 %v2214_v48, %v2214_v48 }
 0x369   :  { %v2219_v20 = vpop.f32.mrf.mxu0 }
 0x36a   :  { %v956_v4 = vadd.f32 %v2214_v48, %v955_v61  ;;  %v963_v8 = vrot.slane %v962_v44, 4  ;;  %v925_v5 = vrot.slane %v2219_v20, 4  ;;  %v932_v42 = vmul.f32 %v2219_v20, %v2219_v20 }
 0x36b   :  { %v2225_v0 = vpop.f32.mrf.mxu0 }
 0x36c   :  { %v957_v58 = vrot.slane %v956_v4, 2  ;;  %v964_v15 = vadd.f32 %v963_v8, %v962_v44  ;;  %v926_v16 = vadd.f32 %v925_v5, %v2219_v20  ;;  %v933_v46 = vrot.slane %v932_v42, 4 }
 0x36d   :  { %v970_v41 = vrot.slane %v2225_v0, 4  ;;  %v977_v49 = vmul.f32 %v2225_v0, %v2225_v0  ;;  %v2231_v3 = vpop.f32.mrf.mxu0 }
 0x36e   :  { %v958_v40 = vadd.f32 %v957_v58, %v956_v4  ;;  %v965_v9 = vrot.slane %v964_v15, 2  ;;  %v927_v35 = vrot.slane %v926_v16, 2  ;;  %v934_v51 = vadd.f32 %v933_v46, %v932_v42 }
 0x36f   :  { %v971_v19 = vadd.f32 %v2225_v0, %v970_v41  ;;  %v978_v55 = vrot.slane %v977_v49, 4  ;;  %v940_v39 = vrot.slane %v2231_v3, 4  ;;  %v947_v43 = vmul.f32 %v2231_v3, %v2231_v3  ;;  %v2237_v34 = vpop.f32.mrf.mxu0 }
 0x370   :  { %v959_v21 = vrot.slane %v958_v40, 1  ;;  %v966_v14 = vadd.f32 %v965_v9, %v964_v15  ;;  %v928_v38 = vadd.f32 %v927_v35, %v926_v16  ;;  %v935_v37 = vrot.slane %v934_v51, 2 }
 0x371   :  { %v972_v6 = vrot.slane %v971_v19, 2  ;;  %v979_v54 = vadd.f32 %v978_v55, %v977_v49  ;;  %v941_v47 = vadd.f32 %v940_v39, %v2231_v3  ;;  %v948_v1 = vrot.slane %v947_v43, 4  ;;  %v2240_v27 = vpop.f32.mrf.mxu0 }
 0x372   :  { %v967_v45 = vrot.slane %v966_v14, 1  ;;  %v929_v33 = vrot.slane %v928_v38, 1  ;;  %v936_v2 = vadd.f32 %v935_v37, %v934_v51  ;;  %v960_v17 = vadd.f32 %v959_v21, %v958_v40 }
 0x373   :  { %v973_v26 = vadd.f32 %v972_v6, %v971_v19  ;;  %v980_v28 = vrot.slane %v979_v54, 2  ;;  %v942_v62 = vrot.slane %v941_v47, 2  ;;  %v949_v53 = vadd.f32 %v948_v1, %v947_v43  ;;  %v2242_v36 = vpop.f32.mrf.mxu0 }
 0x374   :  { %v968_v22 = vadd.f32 %v967_v45, %v966_v14  ;;  %v937_v23 = vrot.slane %v936_v2, 1  ;;  %v1015_v24 = vrot.slane %v2237_v34, 4  ;;  %v930_v60 = vadd.f32 %v929_v33, %v928_v38 }
 0x375   :  { %v974_v25 = vrot.slane %v973_v26, 1  ;;  %v981_v7 = vadd.f32 %v980_v28, %v979_v54  ;;  %v943_v29 = vadd.f32 %v942_v62, %v941_v47  ;;  %v950_v12 = vrot.slane %v949_v53, 2  ;;  %v2249_v13 = vpop.f32.mrf.mxu0 }
 0x376   :  { %v1016_v59 = vadd.f32 %v2237_v34, %v1015_v24  ;;  %v1022_v63 = vmul.f32 %v2237_v34, %v2237_v34  ;;  %v985_v18 = vrot.slane %v2240_v27, 4  ;;  %v938_v57 = vadd.f32 %v937_v23, %v936_v2 }
 0x377   :  { %v975_v56 = vadd.f32 %v974_v25, %v973_v26  ;;  %v944_v11 = vrot.slane %v943_v29, 1  ;;  %v951_v50 = vadd.f32 %v950_v12, %v949_v53  ;;  %v982_v10 = vrot.slane %v981_v7, 1 }
 0x378   :  { %v1023_v31 = vrot.slane %v1022_v63, 4  ;;  %v986_v32 = vadd.f32 %v985_v18, %v2240_v27  ;;  %v992_v52 = vmul.f32 %v2240_v27, %v2240_v27  ;;  %v1017_v4 = vrot.slane %v1016_v59, 2 }
 0x379   :  { %v945_v61 = vadd.f32 %v944_v11, %v943_v29  ;;  %v952_v44 = vrot.slane %v951_v50, 1  ;;  %v1030_v8 = vrot.slane %v2242_v36, 4  ;;  %v1037_v58 = vmul.f32 %v2242_v36, %v2242_v36 }
 0x37a   :  { %v987_v5 = vrot.slane %v986_v32, 2  ;;  %v993_v42 = vrot.slane %v992_v52, 4  ;;  %v1000_v15 = vrot.slane %v2249_v13, 4  ;;  %v1024_v41 = vadd.f32 %v1023_v31, %v1022_v63 }
 0x37b   :  { %v946_v16 = vadd.f32 %v945_v61, %v930_v60  ;;  %v953_v46 = vadd.f32 %v952_v44, %v951_v50  ;;  %v1031_v49 = vadd.f32 %v2242_v36, %v1030_v8  ;;  %v1007_v51 = vmul.f32 %v2249_v13, %v2249_v13 }
 0x37c   :  { %v988_v40 = vadd.f32 %v987_v5, %v986_v32  ;;  %v994_v9 = vadd.f32 %v993_v42, %v992_v52  ;;  %v1001_v35 = vadd.f32 %v1000_v15, %v2249_v13  ;;  %v1018_v55 = vadd.f32 %v1017_v4, %v1016_v59 }
 0x37d   :  { %v961_v19 = vadd.f32 %v960_v17, %v946_v16  ;;  %v1032_v39 = vrot.slane %v1031_v49, 2  ;;  %v954_v43 = vadd.f32 %v953_v46, %v938_v57  ;;  %v1008_v37 = vrot.slane %v1007_v51, 4 }
 0x37e   :  { %v989_v21 = vrot.slane %v988_v40, 1  ;;  %v995_v14 = vrot.slane %v994_v9, 2  ;;  %v1002_v38 = vrot.slane %v1001_v35, 2  ;;  %v1038_v6 = vrot.slane %v1037_v58, 4 }
 0x37f   :  { %v976_v54 = vadd.f32 %v975_v56, %v961_v19  ;;  %v1033_v47 = vadd.f32 %v1032_v39, %v1031_v49  ;;  %v969_v1 = vadd.f32 %v968_v22, %v954_v43  ;;  %v1009_v2 = vadd.f32 %v1008_v37, %v1007_v51  ;;  %v1641_v51 = vld [vmem:[#allocation11 + $0x20] sm:$0xff]   ;;  %v1642_v19 = vld [vmem:[#allocation11 + $0x18] sm:$0xff]   ;;  %v1644_v39 = vld [vmem:[#allocation11 + $0x8] sm:$0xff]  }
 0x380   :  { %v996_v45 = vadd.f32 %v995_v14, %v994_v9  ;;  %v1003_v33 = vadd.f32 %v1002_v38, %v1001_v35  ;;  %v990_v26 = vadd.f32 %v989_v21, %v988_v40  ;;  %v1019_v28 = vrot.slane %v1018_v55, 1  ;;  %v1639_v9 = vld [vmem:[#allocation11 + $0x30] sm:$0xff]   ;;  %v1640_v35 = vld [vmem:[#allocation11 + $0x28] sm:$0xff]   ;;  %v1645_v43 = vld [vmem:[#allocation11] sm:$0xff]  }
 0x381   :  { %v983_v62 = vadd.f32 %v982_v10, %v981_v7  ;;  %v1025_v53 = vrot.slane %v1024_v41, 2  ;;  %v1010_v17 = vrot.slane %v1009_v2, 2  ;;  %v1039_v60 = vadd.f32 %v1038_v6, %v1037_v58 }
 0x382   :  { %v1004_v23 = vrot.slane %v1003_v33, 1  ;;  %v991_v24 = vadd.f32 %v990_v26, %v976_v54  ;;  %v997_v25 = vrot.slane %v996_v45, 1  ;;  %v1034_v18 = vrot.slane %v1033_v47, 1 }
 0x383   :  { %v984_v29 = vadd.f32 %v983_v62, %v969_v1  ;;  %v1026_v12 = vadd.f32 %v1025_v53, %v1024_v41  ;;  %v1011_v59 = vadd.f32 %v1010_v17, %v1009_v2  ;;  %v1020_v56 = vadd.f32 %v1019_v28, %v1018_v55  ;;  %v1638_v41 = vld [vmem:[#allocation11 + $0x38] sm:$0xff]   ;;  %v1643_v55 = vld [vmem:[#allocation11 + $0x10] sm:$0xff]   ;;  %v924_v28 = vld [vmem:[%s2363_s7 + $0x2] sm:$0x1] }
 0x384   :  { %v1005_v63 = vadd.f32 %v1004_v23, %v1003_v33  ;;  %v998_v57 = vadd.f32 %v997_v25, %v996_v45  ;;  %v1040_v22 = vrot.slane %v1039_v60, 2  ;;  %v1035_v10 = vadd.f32 %v1034_v18, %v1033_v47  ;;  %1578 = vmatprep.subr.bf16.mxu1 %v1638_v41  ;;  %v923_v33 = vld [vmem:[%s2362_s6 + $0x2] sm:$0x1] }
 0x385   :  { %v1012_v31 = vrot.slane %v1011_v59, 1  ;;  %v1027_v32 = vrot.slane %v1026_v12, 1  ;;  %1579 = vmatpush3.bf16.msra.mxu1 %v1638_v41 }
 0x386   :  { %v1006_v11 = vadd.f32 %v1005_v63, %v991_v24  ;;  %v999_v50 = vadd.f32 %v998_v57, %v984_v29  ;;  %v1041_v52 = vadd.f32 %v1040_v22, %v1039_v60  ;;  %1580 = vmatprep.subr.bf16.mxu1 %v1639_v9 }
 0x387   :  { %v1013_v61 = vadd.f32 %v1012_v31, %v1011_v59  ;;  %v1028_v5 = vadd.f32 %v1027_v32, %v1026_v12 }
 0x388   :  { %v1021_v7 = vadd.f32 %v1020_v56, %v1006_v11  ;;  %v1042_v44 = vrot.slane %v1041_v52, 1 }
 0x389   :  { %v1014_v8 = vadd.f32 %v1013_v61, %v999_v50  ;;  %1581 = vmatpush3.bf16.msra.mxu1 %v1639_v9 }
 0x38a   :  { %v1036_v4 = vadd.f32 %v1035_v10, %v1021_v7  ;;  %v1043_v58 = vadd.f32 %v1042_v44, %v1041_v52  ;;  %1582 = vmatprep.subr.bf16.mxu1 %v1640_v35 }
 0x38b   :  { %v1029_v42 = vadd.f32 %v1028_v5, %v1014_v8 }
 0x38c   :  { %1045 = vrot.lane.b32.xlu0 %v1036_v4, %s1841_s17 }
 0x38d   :  { %v1044_v15 = vadd.f32 %v1043_v58, %v1029_v42  ;;  %1583 = vmatpush3.bf16.msra.mxu1 %v1640_v35 }
 0x38e   :  { %1584 = vmatprep.subr.bf16.mxu1 %v1641_v51 }
 0x38f   :  { %1051 = vrot.lane.b32.xlu1 %v1044_v15, %s1841_s17 }
 0x391   :  { %1585 = vmatpush3.bf16.msra.mxu1 %v1641_v51 }
 0x392   :  { %1586 = vmatprep.subr.bf16.mxu1 %v1642_v19 }
 0x395   :  { %1587 = vmatpush3.bf16.msra.mxu1 %v1642_v19 }
 0x396   :  { %1588 = vmatprep.subr.bf16.mxu1 %v1643_v55 }
 0x399   :  { %1589 = vmatpush3.bf16.msra.mxu1 %v1643_v55 }
 0x39a   :  { %1590 = vmatprep.subr.bf16.mxu1 %v1644_v39 }
 0x39d   :  { %1591 = vmatpush3.bf16.msra.mxu1 %v1644_v39 }
 0x39e   :  { %1592 = vmatprep.subr.bf16.mxu1 %v1645_v43 }
 0x3a1   :  { %1593 = vmatpush3.bf16.msra.mxu1 %v1645_v43 }
 0x3fe   :  { %v1046_v16 = vpop.permute.xlu0 %1045 }
 0x3ff   :  { %v1047_v46 = vadd.f32 %v1046_v16, %v1036_v4 }
 0x401   :  { %1048 = vrot.lane.b32.xlu0 %v1047_v46, %s1846_s4  ;;  %v1052_v49 = vpop.permute.xlu1 %1051 }
 0x402   :  { %v1053_v40 = vadd.f32 %v1052_v49, %v1044_v15 }
 0x404   :  { %1054 = vrot.lane.b32.xlu1 %v1053_v40, %s1846_s4 }
 0x473   :  { %v1049_v21 = vpop.permute.xlu0 %1048 }
 0x474   :  { %v1050_v14 = vadd.f32 %v1049_v21, %v1047_v46 }
 0x476   :  { %v1057_v38 = vmul.f32 0.00390625, %v1050_v14  ;;  %v1055_v37 = vpop.permute.xlu1 %1054 }
 0x477   :  { %v1056_v54 = vadd.f32 %v1055_v37, %v1053_v40 }
 0x478   :  { %v1059_v6 = vmul.f32 %v1057_v38, %v1057_v38 }
 0x479   :  { %v1058_v47 = vmul.f32 0.00390625, %v1056_v54 }
 0x47b   :  { %v1060_v1 = vsub.f32 %v1058_v47, %v1059_v6 }
 0x47d   :  { %v1061_v45 = vadd.f32 1e-05, %v1060_v1 }
 0x47f   :  { %1682 = vrsqrt.f32 %v1061_v45 }
 0x48c   :  { %v1683_v2 = vpop.eup %1682 }
 0x48d   :  { %v1063_v26 = vmul.f32 %v1683_v2, %v923_v33 }
 0x48f   :  { %v1064_v62 = vmul.f32 %v1063_v26, %v1057_v38  ;;  %v1069_v53 = vrot.slane %v1063_v26, %v2160_v30 }
 0x491   :  { %v1065_v23 = vsub.f32 %v924_v28, %v1064_v62  ;;  %v1070_v17 = vmul.f32 %v1069_v53, %v2219_v20  ;;  %v1071_v25 = vmul.f32 %v1069_v53, %v2231_v3  ;;  %v1072_v29 = vmul.f32 %v2214_v48, %v1069_v53 }
 0x492   :  { %v1073_v12 = vmul.f32 %v2225_v0, %v1069_v53  ;;  %v1074_v60 = vmul.f32 %v1069_v53, %v2240_v27  ;;  %v1075_v59 = vmul.f32 %v1069_v53, %v2249_v13  ;;  %v1076_v48 = vmul.f32 %v2237_v34, %v1069_v53 }
 0x493   :  { %v1081_v24 = vrot.slane %v1065_v23, %v2160_v30  ;;  %v1077_v0 = vmul.f32 %v2242_v36, %v1069_v53 }
 0x495   :  { %v1082_v63 = vadd.f32 %v1081_v24, %v1070_v17  ;;  %v1083_v18 = vadd.f32 %v1081_v24, %v1071_v25  ;;  %v1084_v57 = vadd.f32 %v1081_v24, %v1072_v29  ;;  %v1085_v56 = vadd.f32 %v1081_v24, %v1073_v12 }
 0x496   :  { %v1086_v22 = vadd.f32 %v1081_v24, %v1074_v60  ;;  %v1087_v11 = vadd.f32 %v1081_v24, %v1075_v59  ;;  %v1088_v10 = vadd.f32 %v1081_v24, %v1076_v48  ;;  %v1089_v13 = vadd.f32 %v1081_v24, %v1077_v0 }
 0x497   :  { %v1090_v50 = vmax.f32 %v1082_v63, 0.0  ;;  %v1091_v20 = vmax.f32 %v1083_v18, 0.0  ;;  %v1092_v31 = vmax.f32 %v1084_v57, 0.0  ;;  %v1093_v32 = vmax.f32 %v1085_v56, 0.0 }
 0x498   :  { %v1094_v52 = vmax.f32 %v1086_v22, 0.0  ;;  %v1095_v3 = vmax.f32 %v1087_v11, 0.0  ;;  %v1096_v44 = vmax.f32 %v1088_v10, 0.0  ;;  %v1097_v4 = vmax.f32 %v1089_v13, 0.0 }
 0x499   :  { %v1098_v7 = vpack.c.bf16 %v1091_v20, %v1090_v50  ;;  %v1099_v27 = vpack.c.bf16 %v1093_v32, %v1092_v31 }
 0x49a   :  { %v1100_v61 = vpack.c.bf16 %v1095_v3, %v1094_v52  ;;  %v1101_v8 = vpack.c.bf16 %v1097_v4, %v1096_v44 }
 0x49b   :  { %1594 = vmatprep.mubr.bf16.mxu1 %v1098_v7 }
 0x49c   :  { %1595 = vmatmul.mubr.bf16.vlgmr.msra.gmra.mxu1 %v1099_v27 }
 0x49d   :  { %1598 = vmatprep.mubr.bf16.mxu1 %v1100_v61 }
 0x4a4   :  { %1599 = vmatmul.mubr.bf16.gmra.mxu1 %v1101_v8 }
 0x55c   :  { %v2282_v5 = vpop.f32.mrf.mxu1 }
 0x55d   :  { %v1261_v42 = vrot.slane %v2282_v5, 4  ;;  %v1268_v34 = vmul.f32 %v2282_v5, %v2282_v5 }
 0x55e   :  { %v2287_v36 = vpop.f32.mrf.mxu1 }
 0x55f   :  { %v1262_v58 = vadd.f32 %v2282_v5, %v1261_v42  ;;  %v1269_v15 = vrot.slane %v1268_v34, 4  ;;  %v1231_v16 = vrot.slane %v2287_v36, 4  ;;  %v1238_v46 = vmul.f32 %v2287_v36, %v2287_v36 }
 0x560   :  { %v2293_v41 = vpop.f32.mrf.mxu1 }
 0x561   :  { %v1263_v49 = vrot.slane %v1262_v58, 2  ;;  %v1270_v40 = vadd.f32 %v1269_v15, %v1268_v34  ;;  %v1232_v9 = vadd.f32 %v1231_v16, %v2287_v36  ;;  %v1239_v35 = vrot.slane %v1238_v46, 4 }
 0x562   :  { %v1276_v51 = vrot.slane %v2293_v41, 4  ;;  %v1283_v19 = vmul.f32 %v2293_v41, %v2293_v41  ;;  %v2299_v55 = vpop.f32.mrf.mxu1 }
 0x563   :  { %v1264_v39 = vadd.f32 %v1263_v49, %v1262_v58  ;;  %v1271_v43 = vrot.slane %v1270_v40, 2  ;;  %v1233_v21 = vrot.slane %v1232_v9, 2  ;;  %v1240_v14 = vadd.f32 %v1239_v35, %v1238_v46 }
 0x564   :  { %v1277_v38 = vadd.f32 %v2293_v41, %v1276_v51  ;;  %v1284_v37 = vrot.slane %v1283_v19, 4  ;;  %v1246_v6 = vrot.slane %v2299_v55, 4  ;;  %v1253_v54 = vmul.f32 %v2299_v55, %v2299_v55  ;;  %v2305_v47 = vpop.f32.mrf.mxu1 }
 0x565   :  { %v1265_v1 = vrot.slane %v1264_v39, 1  ;;  %v1272_v45 = vadd.f32 %v1271_v43, %v1270_v40  ;;  %v1234_v33 = vadd.f32 %v1233_v21, %v1232_v9  ;;  %v1241_v2 = vrot.slane %v1240_v14, 2 }
 0x566   :  { %v1278_v26 = vrot.slane %v1277_v38, 2  ;;  %v1285_v28 = vadd.f32 %v1284_v37, %v1283_v19  ;;  %v1247_v62 = vadd.f32 %v1246_v6, %v2299_v55  ;;  %v1254_v53 = vrot.slane %v1253_v54, 4  ;;  %v2308_v23 = vpop.f32.mrf.mxu1 }
 0x567   :  { %v1273_v17 = vrot.slane %v1272_v45, 1  ;;  %v1235_v24 = vrot.slane %v1234_v33, 1  ;;  %v1242_v25 = vadd.f32 %v1241_v2, %v1240_v14  ;;  %v1266_v18 = vadd.f32 %v1265_v1, %v1264_v39 }
 0x568   :  { %v1279_v29 = vadd.f32 %v1278_v26, %v1277_v38  ;;  %v1286_v12 = vrot.slane %v1285_v28, 2  ;;  %v1248_v60 = vrot.slane %v1247_v62, 2  ;;  %v1255_v59 = vadd.f32 %v1254_v53, %v1253_v54  ;;  %v2310_v63 = vpop.f32.mrf.mxu1 }
 0x569   :  { %v1274_v57 = vadd.f32 %v1273_v17, %v1272_v45  ;;  %v1243_v56 = vrot.slane %v1242_v25, 1  ;;  %v1321_v22 = vrot.slane %v2305_v47, 4  ;;  %v1236_v32 = vadd.f32 %v1235_v24, %v1234_v33 }
 0x56a   :  { %v1280_v11 = vrot.slane %v1279_v29, 1  ;;  %v1287_v50 = vadd.f32 %v1286_v12, %v1285_v28  ;;  %v1249_v20 = vadd.f32 %v1248_v60, %v1247_v62  ;;  %v1256_v31 = vrot.slane %v1255_v59, 2  ;;  %v2317_v13 = vpop.f32.mrf.mxu1 }
 0x56b   :  { %v1322_v52 = vadd.f32 %v2305_v47, %v1321_v22  ;;  %v1328_v3 = vmul.f32 %v2305_v47, %v2305_v47  ;;  %v1291_v48 = vrot.slane %v2308_v23, 4  ;;  %v1244_v0 = vadd.f32 %v1243_v56, %v1242_v25 }
 0x56c   :  { %v1281_v7 = vadd.f32 %v1280_v11, %v1279_v29  ;;  %v1250_v27 = vrot.slane %v1249_v20, 1  ;;  %v1257_v10 = vadd.f32 %v1256_v31, %v1255_v59  ;;  %v1288_v61 = vrot.slane %v1287_v50, 1 }
 0x56d   :  { %v1329_v44 = vrot.slane %v1328_v3, 4  ;;  %v1292_v4 = vadd.f32 %v1291_v48, %v2308_v23  ;;  %v1298_v8 = vmul.f32 %v2308_v23, %v2308_v23  ;;  %v1323_v58 = vrot.slane %v1322_v52, 2 }
 0x56e   :  { %v1251_v42 = vadd.f32 %v1250_v27, %v1249_v20  ;;  %v1258_v34 = vrot.slane %v1257_v10, 1  ;;  %v1336_v15 = vrot.slane %v2310_v63, 4  ;;  %v1343_v49 = vmul.f32 %v2310_v63, %v2310_v63 }
 0x56f   :  { %v1293_v16 = vrot.slane %v1292_v4, 2  ;;  %v1299_v46 = vrot.slane %v1298_v8, 4  ;;  %v1306_v40 = vrot.slane %v2317_v13, 4  ;;  %v1330_v51 = vadd.f32 %v1329_v44, %v1328_v3 }
 0x570   :  { %v1252_v9 = vadd.f32 %v1251_v42, %v1236_v32  ;;  %v1259_v35 = vadd.f32 %v1258_v34, %v1257_v10  ;;  %v1337_v19 = vadd.f32 %v2310_v63, %v1336_v15  ;;  %v1313_v14 = vmul.f32 %v2317_v13, %v2317_v13 }
 0x571   :  { %v1294_v39 = vadd.f32 %v1293_v16, %v1292_v4  ;;  %v1300_v43 = vadd.f32 %v1299_v46, %v1298_v8  ;;  %v1307_v21 = vadd.f32 %v1306_v40, %v2317_v13  ;;  %v1324_v37 = vadd.f32 %v1323_v58, %v1322_v52 }
 0x572   :  { %v1267_v38 = vadd.f32 %v1266_v18, %v1252_v9  ;;  %v1338_v6 = vrot.slane %v1337_v19, 2  ;;  %v1260_v54 = vadd.f32 %v1259_v35, %v1244_v0  ;;  %v1314_v2 = vrot.slane %v1313_v14, 4 }
 0x573   :  { %v1295_v1 = vrot.slane %v1294_v39, 1  ;;  %v1301_v45 = vrot.slane %v1300_v43, 2  ;;  %v1308_v33 = vrot.slane %v1307_v21, 2  ;;  %v1344_v26 = vrot.slane %v1343_v49, 4 }
 0x574   :  { %v1282_v28 = vadd.f32 %v1281_v7, %v1267_v38  ;;  %v1339_v62 = vadd.f32 %v1338_v6, %v1337_v19  ;;  %v1275_v53 = vadd.f32 %v1274_v57, %v1260_v54  ;;  %v1315_v25 = vadd.f32 %v1314_v2, %v1313_v14 }
 0x575   :  { %v1302_v17 = vadd.f32 %v1301_v45, %v1300_v43  ;;  %v1309_v24 = vadd.f32 %v1308_v33, %v1307_v21  ;;  %v1296_v29 = vadd.f32 %v1295_v1, %v1294_v39  ;;  %v1325_v12 = vrot.slane %v1324_v37, 1  ;;  %v1367_v45 = vld [vmem:[%s2362_s6 + $0x3] sm:$0x1]  ;;  %s1847_s6 = smov [#allocation13]  }
 0x576   :  { %v1289_v60 = vadd.f32 %v1288_v61, %v1287_v50  ;;  %v1331_v59 = vrot.slane %v1330_v51, 2  ;;  %v1316_v18 = vrot.slane %v1315_v25, 2  ;;  %v1345_v32 = vadd.f32 %v1344_v26, %v1343_v49  ;;  %v1371_v26 = vld [vmem:[%s2363_s7 + $0x3] sm:$0x1]  ;;  %s1411_s28 = sshll.u32 %s1847_s6, 4  ;;  %s1412_s28 = int_to_ptr.vmem [resolvable:$true] %s1411_s28 }
 0x577   :  { %v1310_v56 = vrot.slane %v1309_v24, 1  ;;  %v1297_v22 = vadd.f32 %v1296_v29, %v1282_v28  ;;  %v1303_v11 = vrot.slane %v1302_v17, 1  ;;  %v1340_v48 = vrot.slane %v1339_v62, 1  ;;  %s1806_s7 = scalar_lea.vmem %s1412_s28, 1024  ;;  %p1811_p3 = scmp.lt.s32.totalorder %s1412_s28, %s1412_s28 }
 0x578   :  { %v1290_v20 = vadd.f32 %v1289_v60, %v1275_v53  ;;  %v1332_v31 = vadd.f32 %v1331_v59, %v1330_v51  ;;  %v1317_v52 = vadd.f32 %v1316_v18, %v1315_v25  ;;  %v1326_v7 = vadd.f32 %v1325_v12, %v1324_v37  ;;  %p1807_p2 = scmp.ne.s32.totalorder %s1412_s28, %s1806_s7  ;;  %p1812_p4 = scmp.lt.s32.totalorder %s1806_s7, %s1806_s7 }
 0x579   :  { %v1311_v3 = vadd.f32 %v1310_v56, %v1309_v24  ;;  %v1304_v0 = vadd.f32 %v1303_v11, %v1302_v17  ;;  %v1346_v57 = vrot.slane %v1345_v32, 2  ;;  %v1341_v61 = vadd.f32 %v1340_v48, %v1339_v62 }
 0x57a   :  { %v1318_v44 = vrot.slane %v1317_v52, 1  ;;  %v1333_v4 = vrot.slane %v1332_v31, 1  ;;  %p1813_p5 = por %p1812_p4, %p1811_p3 }
 0x57b   :  { %v1312_v27 = vadd.f32 %v1311_v3, %v1297_v22  ;;  %v1305_v10 = vadd.f32 %v1304_v0, %v1290_v20  ;;  %v1347_v8 = vadd.f32 %v1346_v57, %v1345_v32 }
 0x57c   :  { %v1319_v42 = vadd.f32 %v1318_v44, %v1317_v52  ;;  %v1334_v16 = vadd.f32 %v1333_v4, %v1332_v31  ;;  %p1814_p6 = pnand %p1813_p5, %p1807_p2 }
 0x57d   :  { %v1327_v50 = vadd.f32 %v1326_v7, %v1312_v27  ;;  %v1348_v34 = vrot.slane %v1347_v8, 1 }
 0x57e   :  { %v1320_v15 = vadd.f32 %v1319_v42, %v1305_v10 }
 0x57f   :  { %v1342_v58 = vadd.f32 %v1341_v61, %v1327_v50  ;;  %v1349_v49 = vadd.f32 %v1348_v34, %v1347_v8 }
 0x580   :  { %v1335_v46 = vadd.f32 %v1334_v16, %v1320_v15 }
 0x581   :  { %1351 = vrot.lane.b32.xlu0 %v1342_v58, %s1841_s17 }
 0x582   :  { %v1350_v40 = vadd.f32 %v1349_v49, %v1335_v46 }
 0x584   :  { %1357 = vrot.lane.b32.xlu1 %v1350_v40, %s1841_s17 }
 0x5f3   :  { %v1352_v9 = vpop.permute.xlu0 %1351 }
 0x5f4   :  { %v1353_v35 = vadd.f32 %v1352_v9, %v1342_v58 }
 0x5f6   :  { %1354 = vrot.lane.b32.xlu0 %v1353_v35, %s1846_s4  ;;  %v1358_v51 = vpop.permute.xlu1 %1357 }
 0x5f7   :  { %v1359_v19 = vadd.f32 %v1358_v51, %v1350_v40 }
 0x5f9   :  { %1360 = vrot.lane.b32.xlu1 %v1359_v19, %s1846_s4 }
 0x668   :  { %v1355_v39 = vpop.permute.xlu0 %1354 }
 0x669   :  { %v1356_v43 = vadd.f32 %v1355_v39, %v1353_v35 }
 0x66b   :  { %v1363_v21 = vmul.f32 0.00390625, %v1356_v43  ;;  %v1361_v14 = vpop.permute.xlu1 %1360 }
 0x66c   :  { %v1362_v37 = vadd.f32 %v1361_v14, %v1359_v19 }
 0x66d   :  { %v1365_v38 = vmul.f32 %v1363_v21, %v1363_v21 }
 0x66e   :  { %v1364_v6 = vmul.f32 0.00390625, %v1362_v37 }
 0x670   :  { %v1366_v54 = vsub.f32 %v1364_v6, %v1365_v38 }
 0x672   :  { %v1368_v1 = vadd.f32 1e-05, %v1366_v54 }
 0x674   :  { %1684 = vrsqrt.f32 %v1368_v1 }
 0x681   :  { %v1685_v33 = vpop.eup %1684 }
 0x682   :  { %v1370_v2 = vmul.f32 %v1685_v33, %v1367_v45 }
 0x684   :  { %v1372_v28 = vmul.f32 %v1370_v2, %v1363_v21  ;;  %v1377_v62 = vrot.slane %v1370_v2, %v2160_v30 }
 0x686   :  { %v1373_v53 = vsub.f32 %v1371_v26, %v1372_v28  ;;  %v1378_v17 = vmul.f32 %v1377_v62, %v2287_v36  ;;  %v1379_v25 = vmul.f32 %v1377_v62, %v2299_v55  ;;  %v1380_v29 = vmul.f32 %v2282_v5, %v1377_v62 }
 0x687   :  { %v1381_v12 = vmul.f32 %v2293_v41, %v1377_v62  ;;  %v1382_v60 = vmul.f32 %v1377_v62, %v2308_v23  ;;  %v1383_v59 = vmul.f32 %v1377_v62, %v2317_v13  ;;  %v1384_v56 = vmul.f32 %v2305_v47, %v1377_v62 }
 0x688   :  { %v1389_v24 = vrot.slane %v1373_v53, %v2160_v30  ;;  %v1385_v18 = vmul.f32 %v2310_v63, %v1377_v62 }
 0x68a   :  { %v1390_v22 = vadd.f32 %v1389_v24, %v1378_v17  ;;  %v1391_v36 = vadd.f32 %v1389_v24, %v1379_v25  ;;  %v1392_v11 = vadd.f32 %v1389_v24, %v1380_v29  ;;  %v1393_v30 = vadd.f32 %v1389_v24, %v1381_v12 }
 0x68b   :  { %v1394_v20 = vadd.f32 %v1389_v24, %v1382_v60  ;;  %v1395_v55 = vadd.f32 %v1389_v24, %v1383_v59  ;;  %v1396_v31 = vadd.f32 %v1389_v24, %v1384_v56  ;;  %v1397_v5 = vadd.f32 %v1389_v24, %v1385_v18 }
 0x68c   :  { %1398 = vst [vmem:[#allocation13] sm:$0xff] %v1390_v22  ;;  %1399 = vst [vmem:[#allocation13 + $0x8] sm:$0xff] %v1391_v36 }
 0x68d   :  { %1400 = vst [vmem:[#allocation13 + $0x10] sm:$0xff] %v1392_v11  ;;  %1401 = vst [vmem:[#allocation13 + $0x18] sm:$0xff] %v1393_v30 }
 0x68e   :  { %1402 = vst [vmem:[#allocation13 + $0x20] sm:$0xff] %v1394_v20  ;;  %1403 = vst [vmem:[#allocation13 + $0x28] sm:$0xff] %v1395_v55 }
 0x68f   :  { %1404 = vst [vmem:[#allocation13 + $0x30] sm:$0xff] %v1396_v31  ;;  %1405 = vst [vmem:[#allocation13 + $0x38] sm:$0xff] %v1397_v5 }
 0x690   :  { %1817 = shalt.err (!%p1814_p6)
}
 0x691   :  { %1417 = dma.vmem_to_hbm [thread:$0]  %s1412_s28, 1024, %s2364_s8, [#allocation4], %s1837_s30, %s1837_s30, %s1838_s9  }
 0x692   :  { %1834 = dma.done.wait [#allocation4], 1024  }
 0x693   :  { %1835 = vsyncadd [#allocation4], 4294966272 }
 0x694   :  { %1421 = vsyncpa [#allocation3], 1 }
 0x695   :  { %1422 = vsyncpa [#allocation6], 1 }
 0x696   :  { %1423 = vsyncpa [#allocation9], 1 }
 0x697   :  { %1424 = vsyncpa [#allocation12], 1 }
 0x698   :  { %1425 = vsyncpa [#allocation4], 1 }

</bundles_post_ra>
